<compile_context>
chip_gen: v7x
topology: tpu7x:2x2x1
jax: 0.10.0
libtpu: 0.0.40
codegen_flags: <defaults>
</compile_context>

<pallas_src>
import jax
import jax.numpy as jnp
from jax.experimental import pallas as pl
from jax.experimental.pallas import tpu as pltpu

_LANE = 128
_SUBLANE = 8


def _cdiv(a, b):
    return -(-a // b)


def _round_up(x, m):
    return ((x + m - 1) // m) * m


def _vmem_budget_bytes(frac=0.8):
    """Generation-aware scoped-VMEM target (~80% of physical)."""
    try:
        info = pltpu.get_tpu_info()
        cap = int(getattr(info, "vmem_capacity_bytes", 64 * 1024 * 1024))
    except Exception:
        cap = 64 * 1024 * 1024  # be conservative (v7x) if the query fails
    return int(frac * cap)


def _pick_tile_m(m, target):
    """Row-tile <= target, multiple of 8, minimizing M padding waste."""
    target = max(_SUBLANE, target)
    n_tiles = max(1, _cdiv(m, target))
    return _round_up(_cdiv(m, n_tiles), _SUBLANE)


def _pick_divisor_tile(d, target):
    """Largest multiple of 128 dividing d (d is a multiple of 128), <= target."""
    best = _LANE
    c = _LANE
    while c <= min(d, target):
        if d % c == 0:
            best = c
        c += _LANE
    return best


# ----------------------------------------------------------------------------
# Fused (all layers in one kernel) path.
# ----------------------------------------------------------------------------
def _make_fused_ffn_kernel(n_layers_total):
    """Kernel args: x_ref, w0, b0, w1, b1, ..., w_{L-1}, b_{L-1}, o_ref."""

    def kernel(x_ref, *refs):
        o_ref = refs[-1]
        x = x_ref[0]                                      # (TILE_M, D0_pad) f32
        for l in range(n_layers_total):                   # static unroll
            w = refs[2 * l][0]                            # (Din_pad, Dout_pad) bf16
            b = refs[2 * l + 1][0]                        # (1, Dout_pad) f32
            # bf16 operands, f32 accumulate on the MXU; elementwise stays f32.
            x = jnp.dot(x.astype(jnp.bfloat16), w,
                        preferred_element_type=jnp.float32) + b
            if l < n_layers_total - 1:
                x = jnp.maximum(x, 0.0)                   # ReLU in-register
        o_ref[0] = x.astype(o_ref.dtype)

    return kernel


# ----------------------------------------------------------------------------
# Per-layer fallback path (feature/contraction tiling) for weights that do not
# fit the VMEM budget when fused.
# ----------------------------------------------------------------------------
def _make_linear_kernel(apply_relu):
    def kernel(x_ref, w_ref, b_ref, o_ref, acc_ref):
        k = pl.program_id(3)

        @pl.when(k == 0)
        def _():
            acc_ref[...] = jnp.zeros_like(acc_ref)

        acc_ref[...] += jnp.dot(x_ref[0].astype(jnp.bfloat16), w_ref[0],
                                preferred_element_type=jnp.float32)

        @pl.when(k == pl.num_programs(3) - 1)
        def _():
            y = acc_ref[...] + b_ref[0]
            if apply_relu:
                y = jnp.maximum(y, 0.0)
            o_ref[0] = y.astype(o_ref.dtype)

    return kernel


def _linear_layer(x, w, b, apply_relu, *, tile_m=512, tile_n=512, tile_k=512):
    """x: (N, M, Din) f32 -> (N, M, Dout) f32, tiled matmul + bias (+ReLU)."""
    n, m, d_in = x.shape
    d_out = w.shape[2]
    dip = _round_up(d_in, _LANE)
    dop = _round_up(d_out, _LANE)
    tk = _pick_divisor_tile(dip, tile_k)
    tn = _pick_divisor_tile(dop, tile_n)
    tm = _pick_tile_m(m, tile_m)
    m_pad = _round_up(m, tm)

    x_p = jnp.pad(x, ((0, 0), (0, m_pad - m), (0, dip - d_in)))
    w_p = jnp.pad(w, ((0, 0), (0, dip - d_in), (0, dop - d_out))).astype(jnp.bfloat16)
    b_p = jnp.pad(b.reshape(n, 1, d_out), ((0, 0), (0, 0), (0, dop - d_out)))

    grid = (n, m_pad // tm, dop // tn, dip // tk)

    # VMEM estimate: double-buffered x/out tiles (f32), weight tiles (bf16),
    # f32 accumulator scratch.
    vmem_est = 4 * (2 * tm * tk + 2 * tm * tn + tm * tn) + 2 * (2 * tk * tn) + 4 * 2 * tn
    vmem_limit = min(_vmem_budget_bytes(), max(32 * 1024 * 1024, 2 * vmem_est))

    out = pl.pallas_call(
        _make_linear_kernel(apply_relu),
        out_shape=jax.ShapeDtypeStruct((n, m_pad, dop), x.dtype),
        grid_spec=pltpu.PrefetchScalarGridSpec(
            num_scalar_prefetch=0,
            grid=grid,
            in_specs=[
                pl.BlockSpec((1, tm, tk), lambda i, j, p, k: (i, j, k)),
                pl.BlockSpec((1, tk, tn), lambda i, j, p, k: (i, k, p)),
                pl.BlockSpec((1, 1, tn), lambda i, j, p, k: (i, 0, p)),
            ],
            out_specs=pl.BlockSpec((1, tm, tn), lambda i, j, p, k: (i, j, p)),
            scratch_shapes=[pltpu.VMEM((tm, tn), jnp.float32)],
        ),
        compiler_params=pltpu.CompilerParams(
            dimension_semantics=("parallel", "parallel", "parallel", "arbitrary"),
            vmem_limit_bytes=int(vmem_limit),
        ),
    )(x_p, w_p, b_p)
    return out[:, :m, :d_out]


def _per_layer_ffn(x, params):
    n_total = len(params)
    for l, (w, b) in enumerate(params):
        x = _linear_layer(x, w, b, apply_relu=(l < n_total - 1))
    return x


# ----------------------------------------------------------------------------
# Public entry point.
# ----------------------------------------------------------------------------
def parallel_feedforward_network(state, params, *, tile_m=512, force_per_layer=False):
    """state: (N, B, S, D_in) -> (N, B, S, D_out); params: list of (w, b) with
    w: (N, D_in_l, D_out_l), b: (N, D_out_l).  ReLU after every layer except
    the last, exactly like the nn.Sequential in the module."""
    n, bsz, seq, d_in = state.shape
    m = bsz * seq
    x = state.reshape(n, m, d_in)
    d_out = params[-1][0].shape[2]

    dims_in = [w.shape[1] for w, _ in params]
    dims_out = [w.shape[2] for w, _ in params]
    padded_dims = [(_round_up(di, _LANE), _round_up(do, _LANE))
                   for di, do in zip(dims_in, dims_out)]
    d0_pad = padded_dims[0][0]
    dlast_pad = padded_dims[-1][1]

    budget = _vmem_budget_bytes()

    # M tiling: big tiles, multiple of 8, chosen to minimize padding waste.
    tm = _pick_tile_m(m, tile_m)
    m_pad = _round_up(m, tm)
    num_m_tiles = m_pad // tm

    # VMEM estimate reflecting the actual buffering choices:
    #   bf16 single-buffered weights + f32 biases (resident across M tiles),
    #   f32 double-buffered activation in/out tiles + live inter-layer acts.
    max_dpad = max(max(dip, dop) for dip, dop in padded_dims)
    weight_bytes = sum(2 * dip * dop + 2 * 4 * dop for dip, dop in padded_dims)
    act_bytes = 4 * (2 * tm * d0_pad + 2 * tm * dlast_pad + 2 * tm * max_dpad)
    vmem_est = weight_bytes + act_bytes

    if force_per_layer or vmem_est > budget:
        # Fused weights would not fit VMEM -> per-layer tiled matmuls with
        # output-feature + contraction tiling (activations round-trip HBM).
        out = _per_layer_ffn(x, params)
        return out.reshape(n, bsz, seq, d_out)

    # ------------------------------ fused path ------------------------------
    x_p = jnp.pad(x, ((0, 0), (0, m_pad - m), (0, d0_pad - d_in)))
    ops = []
    for (w, b), (dip, dop) in zip(params, padded_dims):
        di, do = w.shape[1], w.shape[2]
        w_p = jnp.pad(w, ((0, 0), (0, dip - di), (0, dop - do))).astype(jnp.bfloat16)
        b_p = jnp.pad(b.reshape(n, 1, do), ((0, 0), (0, 0), (0, dop - do)))
        ops += [w_p, b_p]

    flops = 2 * n * m_pad * sum(dip * dop for dip, dop in padded_dims)
    bytes_accessed = (4 * int(x_p.size) + 4 * n * m_pad * dlast_pad
                      + sum(int(o.size) * int(o.dtype.itemsize) for o in ops))
    vmem_limit = min(budget, max(32 * 1024 * 1024, 2 * vmem_est))

    def build_call(dim_sem, single_buffer_weights):
        wb_kwargs = ({"pipeline_mode": pl.Buffered(buffer_count=1)}
                     if single_buffer_weights else {})
        in_specs = [pl.BlockSpec((1, tm, d0_pad), lambda i, j: (i, j, 0))]
        for dip, dop in padded_dims:
            # Weight/bias index maps depend only on the N axis -> blocks stay
            # resident in VMEM across all inner M tiles; single-buffered.
            in_specs += [
                pl.BlockSpec((1, dip, dop), lambda i, j: (i, 0, 0), **wb_kwargs),
                pl.BlockSpec((1, 1, dop), lambda i, j: (i, 0, 0), **wb_kwargs),
            ]
        return pl.pallas_call(
            _make_fused_ffn_kernel(len(params)),
            out_shape=jax.ShapeDtypeStruct((n, m_pad, dlast_pad), state.dtype),
            grid_spec=pltpu.PrefetchScalarGridSpec(
                num_scalar_prefetch=0,
                grid=(n, num_m_tiles),        # N outer (weights resident), M inner
                in_specs=in_specs,
                out_specs=pl.BlockSpec((1, tm, dlast_pad), lambda i, j: (i, j, 0)),
            ),
            compiler_params=pltpu.CompilerParams(
                dimension_semantics=dim_sem,
                vmem_limit_bytes=int(vmem_limit),
            ),
            cost_estimate=pl.CostEstimate(
                flops=int(flops), transcendentals=0,
                bytes_accessed=int(bytes_accessed)),
        )

    # Preferred config first (megacore split on M, single-buffered weights);
    # degrade gracefully if this Mosaic version rejects either knob.
    attempts = (
        (("arbitrary", "parallel"), True),
        (("arbitrary", "parallel"), False),
        (("parallel", "parallel"), True),
        (("parallel", "parallel"), False),   # previously-validated config
    )
    out_p = None
    for idx, (dim_sem, single_buf) in enumerate(attempts):
        try:
            out_p = jax.block_until_ready(build_call(dim_sem, single_buf)(x_p, *ops))
            break
        except Exception:
            if idx == len(attempts) - 1:
                raise

    return out_p[:, :m, :d_out].reshape(n, bsz, seq, d_out)


# ----------------------------------------------------------------------------
# Parameter init (matches the module's parameter shapes) + pure-JAX reference.
# ----------------------------------------------------------------------------
def init_parallel_ffn_params(key, n_layers, n_abstractions, input_dim,
                             hidden_dims, output_dim):
    dims = [input_dim] + list(hidden_dims)
    in_dims = dims[:n_layers + 1]
    out_dims = dims[1:n_layers + 1] + [output_dim]
    params = []
    for di, do in zip(in_dims, out_dims):
        key, sub = jax.random.split(key)
        # xavier_uniform bound as PyTorch computes it for a 3-D tensor.
        fan_in = di * do
        fan_out = n_abstractions * do
        bound = (6.0 / (fan_in + fan_out)) ** 0.5
        w = jax.random.uniform(sub, (n_abstractions, di, do),
                               minval=-bound, maxval=bound, dtype=jnp.float32)
        b = jnp.zeros((n_abstractions, do), dtype=jnp.float32)
        params.append((w, b))
    return params


def _reference(state, params):
    n_total = len(params)
    x = state
    for i, (w, bias) in enumerate(params):
        x = jnp.einsum("nbsd,nde->nbse", x, w) + bias[:, None, None, :]
        if i < n_total - 1:
            x = jnp.maximum(x, 0.0)
    return x


if __name__ == "__main__":
    n_layers = 2
    n_abstractions = 3
    input_dim = 16
    hidden_dims = [32, 32]
    output_dim = 8
    batch, seq = 2, 8

    key = jax.random.PRNGKey(0)
    key, k_state = jax.random.split(key)
    state = jax.random.normal(
        k_state, (n_abstractions, batch, seq, input_dim), dtype=jnp.float32)

    params = init_parallel_ffn_params(
        key, n_layers, n_abstractions, input_dim, hidden_dims, output_dim)

    ref = _reference(state, params)

    # Fused path.
    out = jax.block_until_ready(parallel_feedforward_network(state, params))
    assert out.shape == (n_abstractions, batch, seq, output_dim), out.shape
    # bf16 matmul operands with f32 accumulation -> loose tolerance vs f32 ref.
    assert jnp.allclose(out, ref, atol=3e-2, rtol=3e-2), "fused path mismatch"

    # Per-layer fallback path (used when fused weights exceed the VMEM budget).
    out_pl = jax.block_until_ready(
        parallel_feedforward_network(state, params, force_per_layer=True))
    assert out_pl.shape == (n_abstractions, batch, seq, output_dim), out_pl.shape
    assert jnp.allclose(out_pl, ref, atol=3e-2, rtol=3e-2), "per-layer path mismatch"

    print("KERNEL_OK")
</pallas_src>

<mosaic_0001>
module attributes {stable_mosaic.version = 11 : i64} {
  func.func @kernel(%arg0: i32, %arg1: i32, %arg2: memref<1x16x128xf32, #tpu.memory_space<vmem>>, %arg3: memref<1x128x128xbf16, #tpu.memory_space<vmem>>, %arg4: memref<1x1x128xf32, #tpu.memory_space<vmem>>, %arg5: memref<1x128x128xbf16, #tpu.memory_space<vmem>>, %arg6: memref<1x1x128xf32, #tpu.memory_space<vmem>>, %arg7: memref<1x128x128xbf16, #tpu.memory_space<vmem>>, %arg8: memref<1x1x128xf32, #tpu.memory_space<vmem>>, %arg9: memref<1x16x128xf32, #tpu.memory_space<vmem>>) attributes {dimension_semantics = [#tpu.dimension_semantics<arbitrary>, #tpu.dimension_semantics<parallel>], iteration_bounds = array<i64: 3, 1>, scalar_prefetch = 0 : i64, scratch_operands = 0 : i64, tpu.core_type = #tpu.core_type<tc>, window_params = [{transform_indices = @transform_0, window_bounds = array<i64: 1, 16, 128>}, {pipeline_mode = #tpu.pipeline_mode<synchronous>, transform_indices = @transform_1, window_bounds = array<i64: 1, 128, 128>}, {pipeline_mode = #tpu.pipeline_mode<synchronous>, transform_indices = @transform_2, window_bounds = array<i64: 1, 1, 128>}, {pipeline_mode = #tpu.pipeline_mode<synchronous>, transform_indices = @transform_3, window_bounds = array<i64: 1, 128, 128>}, {pipeline_mode = #tpu.pipeline_mode<synchronous>, transform_indices = @transform_4, window_bounds = array<i64: 1, 1, 128>}, {pipeline_mode = #tpu.pipeline_mode<synchronous>, transform_indices = @transform_5, window_bounds = array<i64: 1, 128, 128>}, {pipeline_mode = #tpu.pipeline_mode<synchronous>, transform_indices = @transform_6, window_bounds = array<i64: 1, 1, 128>}, {transform_indices = @transform_7, window_bounds = array<i64: 1, 16, 128>}]} {
    %c0 = arith.constant 0 : index
    %c0_0 = arith.constant 0 : index
    %c0_1 = arith.constant 0 : index
    %0 = vector.load %arg2[%c0, %c0_0, %c0_1] : memref<1x16x128xf32, #tpu.memory_space<vmem>>, vector<1x16x128xf32>
    %1 = vector.shape_cast %0 : vector<1x16x128xf32> to vector<16x128xf32>
    %c0_2 = arith.constant 0 : index
    %c0_3 = arith.constant 0 : index
    %c0_4 = arith.constant 0 : index
    %2 = vector.load %arg3[%c0_2, %c0_3, %c0_4] : memref<1x128x128xbf16, #tpu.memory_space<vmem>>, vector<1x128x128xbf16>
    %3 = vector.shape_cast %2 : vector<1x128x128xbf16> to vector<128x128xbf16>
    %c0_5 = arith.constant 0 : index
    %c0_6 = arith.constant 0 : index
    %c0_7 = arith.constant 0 : index
    %4 = vector.load %arg4[%c0_5, %c0_6, %c0_7] : memref<1x1x128xf32, #tpu.memory_space<vmem>>, vector<1x1x128xf32>
    %5 = vector.shape_cast %4 : vector<1x1x128xf32> to vector<1x128xf32>
    %6 = arith.truncf %1 : vector<16x128xf32> to vector<16x128xbf16>
    %cst = arith.constant dense<0.000000e+00> : vector<16x128xf32>
    %7 = tpu.matmul %6, %3, %cst {dimension_numbers = #tpu.dot_dimension_numbers<[1], [0], [0], [1], [0, 0, 1, 1], [], []>} : vector<16x128xbf16>, vector<128x128xbf16>, vector<16x128xf32> -> vector<16x128xf32>
    %8 = vector.broadcast %5 : vector<1x128xf32> to vector<16x128xf32>
    %9 = arith.addf %7, %8 : vector<16x128xf32>
    %cst_8 = arith.constant 0.000000e+00 : f32
    %10 = vector.broadcast %cst_8 : f32 to vector<16x128xf32>
    %11 = arith.maximumf %9, %10 : vector<16x128xf32>
    %c0_9 = arith.constant 0 : index
    %c0_10 = arith.constant 0 : index
    %c0_11 = arith.constant 0 : index
    %12 = vector.load %arg5[%c0_9, %c0_10, %c0_11] : memref<1x128x128xbf16, #tpu.memory_space<vmem>>, vector<1x128x128xbf16>
    %13 = vector.shape_cast %12 : vector<1x128x128xbf16> to vector<128x128xbf16>
    %c0_12 = arith.constant 0 : index
    %c0_13 = arith.constant 0 : index
    %c0_14 = arith.constant 0 : index
    %14 = vector.load %arg6[%c0_12, %c0_13, %c0_14] : memref<1x1x128xf32, #tpu.memory_space<vmem>>, vector<1x1x128xf32>
    %15 = vector.shape_cast %14 : vector<1x1x128xf32> to vector<1x128xf32>
    %16 = arith.truncf %11 : vector<16x128xf32> to vector<16x128xbf16>
    %cst_15 = arith.constant dense<0.000000e+00> : vector<16x128xf32>
    %17 = tpu.matmul %16, %13, %cst_15 {dimension_numbers = #tpu.dot_dimension_numbers<[1], [0], [0], [1], [0, 0, 1, 1], [], []>} : vector<16x128xbf16>, vector<128x128xbf16>, vector<16x128xf32> -> vector<16x128xf32>
    %18 = vector.broadcast %15 : vector<1x128xf32> to vector<16x128xf32>
    %19 = arith.addf %17, %18 : vector<16x128xf32>
    %cst_16 = arith.constant 0.000000e+00 : f32
    %20 = vector.broadcast %cst_16 : f32 to vector<16x128xf32>
    %21 = arith.maximumf %19, %20 : vector<16x128xf32>
    %c0_17 = arith.constant 0 : index
    %c0_18 = arith.constant 0 : index
    %c0_19 = arith.constant 0 : index
    %22 = vector.load %arg7[%c0_17, %c0_18, %c0_19] : memref<1x128x128xbf16, #tpu.memory_space<vmem>>, vector<1x128x128xbf16>
    %23 = vector.shape_cast %22 : vector<1x128x128xbf16> to vector<128x128xbf16>
    %c0_20 = arith.constant 0 : index
    %c0_21 = arith.constant 0 : index
    %c0_22 = arith.constant 0 : index
    %24 = vector.load %arg8[%c0_20, %c0_21, %c0_22] : memref<1x1x128xf32, #tpu.memory_space<vmem>>, vector<1x1x128xf32>
    %25 = vector.shape_cast %24 : vector<1x1x128xf32> to vector<1x128xf32>
    %26 = arith.truncf %21 : vector<16x128xf32> to vector<16x128xbf16>
    %cst_23 = arith.constant dense<0.000000e+00> : vector<16x128xf32>
    %27 = tpu.matmul %26, %23, %cst_23 {dimension_numbers = #tpu.dot_dimension_numbers<[1], [0], [0], [1], [0, 0, 1, 1], [], []>} : vector<16x128xbf16>, vector<128x128xbf16>, vector<16x128xf32> -> vector<16x128xf32>
    %28 = vector.broadcast %25 : vector<1x128xf32> to vector<16x128xf32>
    %29 = arith.addf %27, %28 : vector<16x128xf32>
    %c0_24 = arith.constant 0 : index
    %c0_25 = arith.constant 0 : index
    %c0_26 = arith.constant 0 : index
    %30 = vector.load %arg9[%c0_24, %c0_25, %c0_26] : memref<1x16x128xf32, #tpu.memory_space<vmem>>, vector<1x16x128xf32>
    %31 = vector.shape_cast %30 : vector<1x16x128xf32> to vector<16x128xf32>
    %32 = vector.shape_cast %29 : vector<16x128xf32> to vector<1x16x128xf32>
    tpu.vector_store %arg9[%c0_24, %c0_25, %c0_26], %32 {strides = array<i32>} : memref<1x16x128xf32, #tpu.memory_space<vmem>>, vector<1x16x128xf32>,
    return
  }
  func.func @transform_0(%arg0: i32, %arg1: i32) -> (i32, i32, i32) {
    %c0_i32 = arith.constant 0 : i32
    %c0_i32_0 = arith.constant 0 : i32
    return %arg0, %arg1, %c0_i32 : i32, i32, i32
  }
  func.func @transform_1(%arg0: i32, %arg1: i32) -> (i32, i32, i32) {
    %c0_i32 = arith.constant 0 : i32
    %c0_i32_0 = arith.constant 0 : i32
    %c0_i32_1 = arith.constant 0 : i32
    return %arg0, %c0_i32, %c0_i32_0 : i32, i32, i32
  }
  func.func @transform_2(%arg0: i32, %arg1: i32) -> (i32, i32, i32) {
    %c0_i32 = arith.constant 0 : i32
    %c0_i32_0 = arith.constant 0 : i32
    %c0_i32_1 = arith.constant 0 : i32
    return %arg0, %c0_i32, %c0_i32_0 : i32, i32, i32
  }
  func.func @transform_3(%arg0: i32, %arg1: i32) -> (i32, i32, i32) {
    %c0_i32 = arith.constant 0 : i32
    %c0_i32_0 = arith.constant 0 : i32
    %c0_i32_1 = arith.constant 0 : i32
    return %arg0, %c0_i32, %c0_i32_0 : i32, i32, i32
  }
  func.func @transform_4(%arg0: i32, %arg1: i32) -> (i32, i32, i32) {
    %c0_i32 = arith.constant 0 : i32
    %c0_i32_0 = arith.constant 0 : i32
    %c0_i32_1 = arith.constant 0 : i32
    return %arg0, %c0_i32, %c0_i32_0 : i32, i32, i32
  }
  func.func @transform_5(%arg0: i32, %arg1: i32) -> (i32, i32, i32) {
    %c0_i32 = arith.constant 0 : i32
    %c0_i32_0 = arith.constant 0 : i32
    %c0_i32_1 = arith.constant 0 : i32
    return %arg0, %c0_i32, %c0_i32_0 : i32, i32, i32
  }
  func.func @transform_6(%arg0: i32, %arg1: i32) -> (i32, i32, i32) {
    %c0_i32 = arith.constant 0 : i32
    %c0_i32_0 = arith.constant 0 : i32
    %c0_i32_1 = arith.constant 0 : i32
    return %arg0, %c0_i32, %c0_i32_0 : i32, i32, i32
  }
  func.func @transform_7(%arg0: i32, %arg1: i32) -> (i32, i32, i32) {
    %c0_i32 = arith.constant 0 : i32
    %c0_i32_0 = arith.constant 0 : i32
    return %arg0, %arg1, %c0_i32 : i32, i32, i32
  }
}

module attributes {stable_mosaic.version = 11 : i64} {
  func.func @kernel(%arg0: i32, %arg1: i32, %arg2: memref<1x16x128xf32, #tpu.memory_space<vmem>>, %arg3: memref<1x128x128xbf16, #tpu.memory_space<vmem>>, %arg4: memref<1x1x128xf32, #tpu.memory_space<vmem>>, %arg5: memref<1x128x128xbf16, #tpu.memory_space<vmem>>, %arg6: memref<1x1x128xf32, #tpu.memory_space<vmem>>, %arg7: memref<1x128x128xbf16, #tpu.memory_space<vmem>>, %arg8: memref<1x1x128xf32, #tpu.memory_space<vmem>>, %arg9: memref<1x16x128xf32, #tpu.memory_space<vmem>>) attributes {dimension_semantics = [#tpu.dimension_semantics<arbitrary>, #tpu.dimension_semantics<parallel>], iteration_bounds = array<i64: 3, 1>, scalar_prefetch = 0 : i64, scratch_operands = 0 : i64, tpu.core_type = #tpu.core_type<tc>, window_params = [{transform_indices = @transform_0, window_bounds = array<i64: 1, 16, 128>}, {transform_indices = @transform_1, window_bounds = array<i64: 1, 128, 128>}, {transform_indices = @transform_2, window_bounds = array<i64: 1, 1, 128>}, {transform_indices = @transform_3, window_bounds = array<i64: 1, 128, 128>}, {transform_indices = @transform_4, window_bounds = array<i64: 1, 1, 128>}, {transform_indices = @transform_5, window_bounds = array<i64: 1, 128, 128>}, {transform_indices = @transform_6, window_bounds = array<i64: 1, 1, 128>}, {transform_indices = @transform_7, window_bounds = array<i64: 1, 16, 128>}]} {
    %c0 = arith.constant 0 : index
    %c0_0 = arith.constant 0 : index
    %c0_1 = arith.constant 0 : index
    %0 = vector.load %arg2[%c0, %c0_0, %c0_1] : memref<1x16x128xf32, #tpu.memory_space<vmem>>, vector<1x16x128xf32>
    %1 = vector.shape_cast %0 : vector<1x16x128xf32> to vector<16x128xf32>
    %c0_2 = arith.constant 0 : index
    %c0_3 = arith.constant 0 : index
    %c0_4 = arith.constant 0 : index
    %2 = vector.load %arg3[%c0_2, %c0_3, %c0_4] : memref<1x128x128xbf16, #tpu.memory_space<vmem>>, vector<1x128x128xbf16>
    %3 = vector.shape_cast %2 : vector<1x128x128xbf16> to vector<128x128xbf16>
    %c0_5 = arith.constant 0 : index
    %c0_6 = arith.constant 0 : index
    %c0_7 = arith.constant 0 : index
    %4 = vector.load %arg4[%c0_5, %c0_6, %c0_7] : memref<1x1x128xf32, #tpu.memory_space<vmem>>, vector<1x1x128xf32>
    %5 = vector.shape_cast %4 : vector<1x1x128xf32> to vector<1x128xf32>
    %6 = arith.truncf %1 : vector<16x128xf32> to vector<16x128xbf16>
    %cst = arith.constant dense<0.000000e+00> : vector<16x128xf32>
    %7 = tpu.matmul %6, %3, %cst {dimension_numbers = #tpu.dot_dimension_numbers<[1], [0], [0], [1], [0, 0, 1, 1], [], []>} : vector<16x128xbf16>, vector<128x128xbf16>, vector<16x128xf32> -> vector<16x128xf32>
    %8 = vector.broadcast %5 : vector<1x128xf32> to vector<16x128xf32>
    %9 = arith.addf %7, %8 : vector<16x128xf32>
    %cst_8 = arith.constant 0.000000e+00 : f32
    %10 = vector.broadcast %cst_8 : f32 to vector<16x128xf32>
    %11 = arith.maximumf %9, %10 : vector<16x128xf32>
    %c0_9 = arith.constant 0 : index
    %c0_10 = arith.constant 0 : index
    %c0_11 = arith.constant 0 : index
    %12 = vector.load %arg5[%c0_9, %c0_10, %c0_11] : memref<1x128x128xbf16, #tpu.memory_space<vmem>>, vector<1x128x128xbf16>
    %13 = vector.shape_cast %12 : vector<1x128x128xbf16> to vector<128x128xbf16>
    %c0_12 = arith.constant 0 : index
    %c0_13 = arith.constant 0 : index
    %c0_14 = arith.constant 0 : index
    %14 = vector.load %arg6[%c0_12, %c0_13, %c0_14] : memref<1x1x128xf32, #tpu.memory_space<vmem>>, vector<1x1x128xf32>
    %15 = vector.shape_cast %14 : vector<1x1x128xf32> to vector<1x128xf32>
    %16 = arith.truncf %11 : vector<16x128xf32> to vector<16x128xbf16>
    %cst_15 = arith.constant dense<0.000000e+00> : vector<16x128xf32>
    %17 = tpu.matmul %16, %13, %cst_15 {dimension_numbers = #tpu.dot_dimension_numbers<[1], [0], [0], [1], [0, 0, 1, 1], [], []>} : vector<16x128xbf16>, vector<128x128xbf16>, vector<16x128xf32> -> vector<16x128xf32>
    %18 = vector.broadcast %15 : vector<1x128xf32> to vector<16x128xf32>
    %19 = arith.addf %17, %18 : vector<16x128xf32>
    %cst_16 = arith.constant 0.000000e+00 : f32
    %20 = vector.broadcast %cst_16 : f32 to vector<16x128xf32>
    %21 = arith.maximumf %19, %20 : vector<16x128xf32>
    %c0_17 = arith.constant 0 : index
    %c0_18 = arith.constant 0 : index
    %c0_19 = arith.constant 0 : index
    %22 = vector.load %arg7[%c0_17, %c0_18, %c0_19] : memref<1x128x128xbf16, #tpu.memory_space<vmem>>, vector<1x128x128xbf16>
    %23 = vector.shape_cast %22 : vector<1x128x128xbf16> to vector<128x128xbf16>
    %c0_20 = arith.constant 0 : index
    %c0_21 = arith.constant 0 : index
    %c0_22 = arith.constant 0 : index
    %24 = vector.load %arg8[%c0_20, %c0_21, %c0_22] : memref<1x1x128xf32, #tpu.memory_space<vmem>>, vector<1x1x128xf32>
    %25 = vector.shape_cast %24 : vector<1x1x128xf32> to vector<1x128xf32>
    %26 = arith.truncf %21 : vector<16x128xf32> to vector<16x128xbf16>
    %cst_23 = arith.constant dense<0.000000e+00> : vector<16x128xf32>
    %27 = tpu.matmul %26, %23, %cst_23 {dimension_numbers = #tpu.dot_dimension_numbers<[1], [0], [0], [1], [0, 0, 1, 1], [], []>} : vector<16x128xbf16>, vector<128x128xbf16>, vector<16x128xf32> -> vector<16x128xf32>
    %28 = vector.broadcast %25 : vector<1x128xf32> to vector<16x128xf32>
    %29 = arith.addf %27, %28 : vector<16x128xf32>
    %c0_24 = arith.constant 0 : index
    %c0_25 = arith.constant 0 : index
    %c0_26 = arith.constant 0 : index
    %30 = vector.load %arg9[%c0_24, %c0_25, %c0_26] : memref<1x16x128xf32, #tpu.memory_space<vmem>>, vector<1x16x128xf32>
    %31 = vector.shape_cast %30 : vector<1x16x128xf32> to vector<16x128xf32>
    %32 = vector.shape_cast %29 : vector<16x128xf32> to vector<1x16x128xf32>
    tpu.vector_store %arg9[%c0_24, %c0_25, %c0_26], %32 {strides = array<i32>} : memref<1x16x128xf32, #tpu.memory_space<vmem>>, vector<1x16x128xf32>,
    return
  }
  func.func @transform_0(%arg0: i32, %arg1: i32) -> (i32, i32, i32) {
    %c0_i32 = arith.constant 0 : i32
    %c0_i32_0 = arith.constant 0 : i32
    return %arg0, %arg1, %c0_i32 : i32, i32, i32
  }
  func.func @transform_1(%arg0: i32, %arg1: i32) -> (i32, i32, i32) {
    %c0_i32 = arith.constant 0 : i32
    %c0_i32_0 = arith.constant 0 : i32
    %c0_i32_1 = arith.constant 0 : i32
    return %arg0, %c0_i32, %c0_i32_0 : i32, i32, i32
  }
  func.func @transform_2(%arg0: i32, %arg1: i32) -> (i32, i32, i32) {
    %c0_i32 = arith.constant 0 : i32
    %c0_i32_0 = arith.constant 0 : i32
    %c0_i32_1 = arith.constant 0 : i32
    return %arg0, %c0_i32, %c0_i32_0 : i32, i32, i32
  }
  func.func @transform_3(%arg0: i32, %arg1: i32) -> (i32, i32, i32) {
    %c0_i32 = arith.constant 0 : i32
    %c0_i32_0 = arith.constant 0 : i32
    %c0_i32_1 = arith.constant 0 : i32
    return %arg0, %c0_i32, %c0_i32_0 : i32, i32, i32
  }
  func.func @transform_4(%arg0: i32, %arg1: i32) -> (i32, i32, i32) {
    %c0_i32 = arith.constant 0 : i32
    %c0_i32_0 = arith.constant 0 : i32
    %c0_i32_1 = arith.constant 0 : i32
    return %arg0, %c0_i32, %c0_i32_0 : i32, i32, i32
  }
  func.func @transform_5(%arg0: i32, %arg1: i32) -> (i32, i32, i32) {
    %c0_i32 = arith.constant 0 : i32
    %c0_i32_0 = arith.constant 0 : i32
    %c0_i32_1 = arith.constant 0 : i32
    return %arg0, %c0_i32, %c0_i32_0 : i32, i32, i32
  }
  func.func @transform_6(%arg0: i32, %arg1: i32) -> (i32, i32, i32) {
    %c0_i32 = arith.constant 0 : i32
    %c0_i32_0 = arith.constant 0 : i32
    %c0_i32_1 = arith.constant 0 : i32
    return %arg0, %c0_i32, %c0_i32_0 : i32, i32, i32
  }
  func.func @transform_7(%arg0: i32, %arg1: i32) -> (i32, i32, i32) {
    %c0_i32 = arith.constant 0 : i32
    %c0_i32_0 = arith.constant 0 : i32
    return %arg0, %arg1, %c0_i32 : i32, i32, i32
  }
}

module attributes {stable_mosaic.version = 11 : i64} {
  func.func @kernel(%arg0: i32, %arg1: i32, %arg2: memref<1x16x128xf32, #tpu.memory_space<vmem>>, %arg3: memref<1x128x128xbf16, #tpu.memory_space<vmem>>, %arg4: memref<1x1x128xf32, #tpu.memory_space<vmem>>, %arg5: memref<1x128x128xbf16, #tpu.memory_space<vmem>>, %arg6: memref<1x1x128xf32, #tpu.memory_space<vmem>>, %arg7: memref<1x128x128xbf16, #tpu.memory_space<vmem>>, %arg8: memref<1x1x128xf32, #tpu.memory_space<vmem>>, %arg9: memref<1x16x128xf32, #tpu.memory_space<vmem>>) attributes {dimension_semantics = [#tpu.dimension_semantics<parallel>, #tpu.dimension_semantics<parallel>], iteration_bounds = array<i64: 3, 1>, scalar_prefetch = 0 : i64, scratch_operands = 0 : i64, tpu.core_type = #tpu.core_type<tc>, window_params = [{transform_indices = @transform_0, window_bounds = array<i64: 1, 16, 128>}, {pipeline_mode = #tpu.pipeline_mode<synchronous>, transform_indices = @transform_1, window_bounds = array<i64: 1, 128, 128>}, {pipeline_mode = #tpu.pipeline_mode<synchronous>, transform_indices = @transform_2, window_bounds = array<i64: 1, 1, 128>}, {pipeline_mode = #tpu.pipeline_mode<synchronous>, transform_indices = @transform_3, window_bounds = array<i64: 1, 128, 128>}, {pipeline_mode = #tpu.pipeline_mode<synchronous>, transform_indices = @transform_4, window_bounds = array<i64: 1, 1, 128>}, {pipeline_mode = #tpu.pipeline_mode<synchronous>, transform_indices = @transform_5, window_bounds = array<i64: 1, 128, 128>}, {pipeline_mode = #tpu.pipeline_mode<synchronous>, transform_indices = @transform_6, window_bounds = array<i64: 1, 1, 128>}, {transform_indices = @transform_7, window_bounds = array<i64: 1, 16, 128>}]} {
    %c0 = arith.constant 0 : index
    %c0_0 = arith.constant 0 : index
    %c0_1 = arith.constant 0 : index
    %0 = vector.load %arg2[%c0, %c0_0, %c0_1] : memref<1x16x128xf32, #tpu.memory_space<vmem>>, vector<1x16x128xf32>
    %1 = vector.shape_cast %0 : vector<1x16x128xf32> to vector<16x128xf32>
    %c0_2 = arith.constant 0 : index
    %c0_3 = arith.constant 0 : index
    %c0_4 = arith.constant 0 : index
    %2 = vector.load %arg3[%c0_2, %c0_3, %c0_4] : memref<1x128x128xbf16, #tpu.memory_space<vmem>>, vector<1x128x128xbf16>
    %3 = vector.shape_cast %2 : vector<1x128x128xbf16> to vector<128x128xbf16>
    %c0_5 = arith.constant 0 : index
    %c0_6 = arith.constant 0 : index
    %c0_7 = arith.constant 0 : index
    %4 = vector.load %arg4[%c0_5, %c0_6, %c0_7] : memref<1x1x128xf32, #tpu.memory_space<vmem>>, vector<1x1x128xf32>
    %5 = vector.shape_cast %4 : vector<1x1x128xf32> to vector<1x128xf32>
    %6 = arith.truncf %1 : vector<16x128xf32> to vector<16x128xbf16>
    %cst = arith.constant dense<0.000000e+00> : vector<16x128xf32>
    %7 = tpu.matmul %6, %3, %cst {dimension_numbers = #tpu.dot_dimension_numbers<[1], [0], [0], [1], [0, 0, 1, 1], [], []>} : vector<16x128xbf16>, vector<128x128xbf16>, vector<16x128xf32> -> vector<16x128xf32>
    %8 = vector.broadcast %5 : vector<1x128xf32> to vector<16x128xf32>
    %9 = arith.addf %7, %8 : vector<16x128xf32>
    %cst_8 = arith.constant 0.000000e+00 : f32
    %10 = vector.broadcast %cst_8 : f32 to vector<16x128xf32>
    %11 = arith.maximumf %9, %10 : vector<16x128xf32>
    %c0_9 = arith.constant 0 : index
    %c0_10 = arith.constant 0 : index
    %c0_11 = arith.constant 0 : index
    %12 = vector.load %arg5[%c0_9, %c0_10, %c0_11] : memref<1x128x128xbf16, #tpu.memory_space<vmem>>, vector<1x128x128xbf16>
    %13 = vector.shape_cast %12 : vector<1x128x128xbf16> to vector<128x128xbf16>
    %c0_12 = arith.constant 0 : index
    %c0_13 = arith.constant 0 : index
    %c0_14 = arith.constant 0 : index
    %14 = vector.load %arg6[%c0_12, %c0_13, %c0_14] : memref<1x1x128xf32, #tpu.memory_space<vmem>>, vector<1x1x128xf32>
    %15 = vector.shape_cast %14 : vector<1x1x128xf32> to vector<1x128xf32>
    %16 = arith.truncf %11 : vector<16x128xf32> to vector<16x128xbf16>
    %cst_15 = arith.constant dense<0.000000e+00> : vector<16x128xf32>
    %17 = tpu.matmul %16, %13, %cst_15 {dimension_numbers = #tpu.dot_dimension_numbers<[1], [0], [0], [1], [0, 0, 1, 1], [], []>} : vector<16x128xbf16>, vector<128x128xbf16>, vector<16x128xf32> -> vector<16x128xf32>
    %18 = vector.broadcast %15 : vector<1x128xf32> to vector<16x128xf32>
    %19 = arith.addf %17, %18 : vector<16x128xf32>
    %cst_16 = arith.constant 0.000000e+00 : f32
    %20 = vector.broadcast %cst_16 : f32 to vector<16x128xf32>
    %21 = arith.maximumf %19, %20 : vector<16x128xf32>
    %c0_17 = arith.constant 0 : index
    %c0_18 = arith.constant 0 : index
    %c0_19 = arith.constant 0 : index
    %22 = vector.load %arg7[%c0_17, %c0_18, %c0_19] : memref<1x128x128xbf16, #tpu.memory_space<vmem>>, vector<1x128x128xbf16>
    %23 = vector.shape_cast %22 : vector<1x128x128xbf16> to vector<128x128xbf16>
    %c0_20 = arith.constant 0 : index
    %c0_21 = arith.constant 0 : index
    %c0_22 = arith.constant 0 : index
    %24 = vector.load %arg8[%c0_20, %c0_21, %c0_22] : memref<1x1x128xf32, #tpu.memory_space<vmem>>, vector<1x1x128xf32>
    %25 = vector.shape_cast %24 : vector<1x1x128xf32> to vector<1x128xf32>
    %26 = arith.truncf %21 : vector<16x128xf32> to vector<16x128xbf16>
    %cst_23 = arith.constant dense<0.000000e+00> : vector<16x128xf32>
    %27 = tpu.matmul %26, %23, %cst_23 {dimension_numbers = #tpu.dot_dimension_numbers<[1], [0], [0], [1], [0, 0, 1, 1], [], []>} : vector<16x128xbf16>, vector<128x128xbf16>, vector<16x128xf32> -> vector<16x128xf32>
    %28 = vector.broadcast %25 : vector<1x128xf32> to vector<16x128xf32>
    %29 = arith.addf %27, %28 : vector<16x128xf32>
    %c0_24 = arith.constant 0 : index
    %c0_25 = arith.constant 0 : index
    %c0_26 = arith.constant 0 : index
    %30 = vector.load %arg9[%c0_24, %c0_25, %c0_26] : memref<1x16x128xf32, #tpu.memory_space<vmem>>, vector<1x16x128xf32>
    %31 = vector.shape_cast %30 : vector<1x16x128xf32> to vector<16x128xf32>
    %32 = vector.shape_cast %29 : vector<16x128xf32> to vector<1x16x128xf32>
    tpu.vector_store %arg9[%c0_24, %c0_25, %c0_26], %32 {strides = array<i32>} : memref<1x16x128xf32, #tpu.memory_space<vmem>>, vector<1x16x128xf32>,
    return
  }
  func.func @transform_0(%arg0: i32, %arg1: i32) -> (i32, i32, i32) {
    %c0_i32 = arith.constant 0 : i32
    %c0_i32_0 = arith.constant 0 : i32
    return %arg0, %arg1, %c0_i32 : i32, i32, i32
  }
  func.func @transform_1(%arg0: i32, %arg1: i32) -> (i32, i32, i32) {
    %c0_i32 = arith.constant 0 : i32
    %c0_i32_0 = arith.constant 0 : i32
    %c0_i32_1 = arith.constant 0 : i32
    return %arg0, %c0_i32, %c0_i32_0 : i32, i32, i32
  }
  func.func @transform_2(%arg0: i32, %arg1: i32) -> (i32, i32, i32) {
    %c0_i32 = arith.constant 0 : i32
    %c0_i32_0 = arith.constant 0 : i32
    %c0_i32_1 = arith.constant 0 : i32
    return %arg0, %c0_i32, %c0_i32_0 : i32, i32, i32
  }
  func.func @transform_3(%arg0: i32, %arg1: i32) -> (i32, i32, i32) {
    %c0_i32 = arith.constant 0 : i32
    %c0_i32_0 = arith.constant 0 : i32
    %c0_i32_1 = arith.constant 0 : i32
    return %arg0, %c0_i32, %c0_i32_0 : i32, i32, i32
  }
  func.func @transform_4(%arg0: i32, %arg1: i32) -> (i32, i32, i32) {
    %c0_i32 = arith.constant 0 : i32
    %c0_i32_0 = arith.constant 0 : i32
    %c0_i32_1 = arith.constant 0 : i32
    return %arg0, %c0_i32, %c0_i32_0 : i32, i32, i32
  }
  func.func @transform_5(%arg0: i32, %arg1: i32) -> (i32, i32, i32) {
    %c0_i32 = arith.constant 0 : i32
    %c0_i32_0 = arith.constant 0 : i32
    %c0_i32_1 = arith.constant 0 : i32
    return %arg0, %c0_i32, %c0_i32_0 : i32, i32, i32
  }
  func.func @transform_6(%arg0: i32, %arg1: i32) -> (i32, i32, i32) {
    %c0_i32 = arith.constant 0 : i32
    %c0_i32_0 = arith.constant 0 : i32
    %c0_i32_1 = arith.constant 0 : i32
    return %arg0, %c0_i32, %c0_i32_0 : i32, i32, i32
  }
  func.func @transform_7(%arg0: i32, %arg1: i32) -> (i32, i32, i32) {
    %c0_i32 = arith.constant 0 : i32
    %c0_i32_0 = arith.constant 0 : i32
    return %arg0, %arg1, %c0_i32 : i32, i32, i32
  }
}

module attributes {stable_mosaic.version = 11 : i64} {
  func.func @kernel(%arg0: i32, %arg1: i32, %arg2: memref<1x16x128xf32, #tpu.memory_space<vmem>>, %arg3: memref<1x128x128xbf16, #tpu.memory_space<vmem>>, %arg4: memref<1x1x128xf32, #tpu.memory_space<vmem>>, %arg5: memref<1x128x128xbf16, #tpu.memory_space<vmem>>, %arg6: memref<1x1x128xf32, #tpu.memory_space<vmem>>, %arg7: memref<1x128x128xbf16, #tpu.memory_space<vmem>>, %arg8: memref<1x1x128xf32, #tpu.memory_space<vmem>>, %arg9: memref<1x16x128xf32, #tpu.memory_space<vmem>>) attributes {dimension_semantics = [#tpu.dimension_semantics<parallel>, #tpu.dimension_semantics<parallel>], iteration_bounds = array<i64: 3, 1>, scalar_prefetch = 0 : i64, scratch_operands = 0 : i64, tpu.core_type = #tpu.core_type<tc>, window_params = [{transform_indices = @transform_0, window_bounds = array<i64: 1, 16, 128>}, {transform_indices = @transform_1, window_bounds = array<i64: 1, 128, 128>}, {transform_indices = @transform_2, window_bounds = array<i64: 1, 1, 128>}, {transform_indices = @transform_3, window_bounds = array<i64: 1, 128, 128>}, {transform_indices = @transform_4, window_bounds = array<i64: 1, 1, 128>}, {transform_indices = @transform_5, window_bounds = array<i64: 1, 128, 128>}, {transform_indices = @transform_6, window_bounds = array<i64: 1, 1, 128>}, {transform_indices = @transform_7, window_bounds = array<i64: 1, 16, 128>}]} {
    %c0 = arith.constant 0 : index
    %c0_0 = arith.constant 0 : index
    %c0_1 = arith.constant 0 : index
    %0 = vector.load %arg2[%c0, %c0_0, %c0_1] : memref<1x16x128xf32, #tpu.memory_space<vmem>>, vector<1x16x128xf32>
    %1 = vector.shape_cast %0 : vector<1x16x128xf32> to vector<16x128xf32>
    %c0_2 = arith.constant 0 : index
    %c0_3 = arith.constant 0 : index
    %c0_4 = arith.constant 0 : index
    %2 = vector.load %arg3[%c0_2, %c0_3, %c0_4] : memref<1x128x128xbf16, #tpu.memory_space<vmem>>, vector<1x128x128xbf16>
    %3 = vector.shape_cast %2 : vector<1x128x128xbf16> to vector<128x128xbf16>
    %c0_5 = arith.constant 0 : index
    %c0_6 = arith.constant 0 : index
    %c0_7 = arith.constant 0 : index
    %4 = vector.load %arg4[%c0_5, %c0_6, %c0_7] : memref<1x1x128xf32, #tpu.memory_space<vmem>>, vector<1x1x128xf32>
    %5 = vector.shape_cast %4 : vector<1x1x128xf32> to vector<1x128xf32>
    %6 = arith.truncf %1 : vector<16x128xf32> to vector<16x128xbf16>
    %cst = arith.constant dense<0.000000e+00> : vector<16x128xf32>
    %7 = tpu.matmul %6, %3, %cst {dimension_numbers = #tpu.dot_dimension_numbers<[1], [0], [0], [1], [0, 0, 1, 1], [], []>} : vector<16x128xbf16>, vector<128x128xbf16>, vector<16x128xf32> -> vector<16x128xf32>
    %8 = vector.broadcast %5 : vector<1x128xf32> to vector<16x128xf32>
    %9 = arith.addf %7, %8 : vector<16x128xf32>
    %cst_8 = arith.constant 0.000000e+00 : f32
    %10 = vector.broadcast %cst_8 : f32 to vector<16x128xf32>
    %11 = arith.maximumf %9, %10 : vector<16x128xf32>
    %c0_9 = arith.constant 0 : index
    %c0_10 = arith.constant 0 : index
    %c0_11 = arith.constant 0 : index
    %12 = vector.load %arg5[%c0_9, %c0_10, %c0_11] : memref<1x128x128xbf16, #tpu.memory_space<vmem>>, vector<1x128x128xbf16>
    %13 = vector.shape_cast %12 : vector<1x128x128xbf16> to vector<128x128xbf16>
    %c0_12 = arith.constant 0 : index
    %c0_13 = arith.constant 0 : index
    %c0_14 = arith.constant 0 : index
    %14 = vector.load %arg6[%c0_12, %c0_13, %c0_14] : memref<1x1x128xf32, #tpu.memory_space<vmem>>, vector<1x1x128xf32>
    %15 = vector.shape_cast %14 : vector<1x1x128xf32> to vector<1x128xf32>
    %16 = arith.truncf %11 : vector<16x128xf32> to vector<16x128xbf16>
    %cst_15 = arith.constant dense<0.000000e+00> : vector<16x128xf32>
    %17 = tpu.matmul %16, %13, %cst_15 {dimension_numbers = #tpu.dot_dimension_numbers<[1], [0], [0], [1], [0, 0, 1, 1], [], []>} : vector<16x128xbf16>, vector<128x128xbf16>, vector<16x128xf32> -> vector<16x128xf32>
    %18 = vector.broadcast %15 : vector<1x128xf32> to vector<16x128xf32>
    %19 = arith.addf %17, %18 : vector<16x128xf32>
    %cst_16 = arith.constant 0.000000e+00 : f32
    %20 = vector.broadcast %cst_16 : f32 to vector<16x128xf32>
    %21 = arith.maximumf %19, %20 : vector<16x128xf32>
    %c0_17 = arith.constant 0 : index
    %c0_18 = arith.constant 0 : index
    %c0_19 = arith.constant 0 : index
    %22 = vector.load %arg7[%c0_17, %c0_18, %c0_19] : memref<1x128x128xbf16, #tpu.memory_space<vmem>>, vector<1x128x128xbf16>
    %23 = vector.shape_cast %22 : vector<1x128x128xbf16> to vector<128x128xbf16>
    %c0_20 = arith.constant 0 : index
    %c0_21 = arith.constant 0 : index
    %c0_22 = arith.constant 0 : index
    %24 = vector.load %arg8[%c0_20, %c0_21, %c0_22] : memref<1x1x128xf32, #tpu.memory_space<vmem>>, vector<1x1x128xf32>
    %25 = vector.shape_cast %24 : vector<1x1x128xf32> to vector<1x128xf32>
    %26 = arith.truncf %21 : vector<16x128xf32> to vector<16x128xbf16>
    %cst_23 = arith.constant dense<0.000000e+00> : vector<16x128xf32>
    %27 = tpu.matmul %26, %23, %cst_23 {dimension_numbers = #tpu.dot_dimension_numbers<[1], [0], [0], [1], [0, 0, 1, 1], [], []>} : vector<16x128xbf16>, vector<128x128xbf16>, vector<16x128xf32> -> vector<16x128xf32>
    %28 = vector.broadcast %25 : vector<1x128xf32> to vector<16x128xf32>
    %29 = arith.addf %27, %28 : vector<16x128xf32>
    %c0_24 = arith.constant 0 : index
    %c0_25 = arith.constant 0 : index
    %c0_26 = arith.constant 0 : index
    %30 = vector.load %arg9[%c0_24, %c0_25, %c0_26] : memref<1x16x128xf32, #tpu.memory_space<vmem>>, vector<1x16x128xf32>
    %31 = vector.shape_cast %30 : vector<1x16x128xf32> to vector<16x128xf32>
    %32 = vector.shape_cast %29 : vector<16x128xf32> to vector<1x16x128xf32>
    tpu.vector_store %arg9[%c0_24, %c0_25, %c0_26], %32 {strides = array<i32>} : memref<1x16x128xf32, #tpu.memory_space<vmem>>, vector<1x16x128xf32>,
    return
  }
  func.func @transform_0(%arg0: i32, %arg1: i32) -> (i32, i32, i32) {
    %c0_i32 = arith.constant 0 : i32
    %c0_i32_0 = arith.constant 0 : i32
    return %arg0, %arg1, %c0_i32 : i32, i32, i32
  }
  func.func @transform_1(%arg0: i32, %arg1: i32) -> (i32, i32, i32) {
    %c0_i32 = arith.constant 0 : i32
    %c0_i32_0 = arith.constant 0 : i32
    %c0_i32_1 = arith.constant 0 : i32
    return %arg0, %c0_i32, %c0_i32_0 : i32, i32, i32
  }
  func.func @transform_2(%arg0: i32, %arg1: i32) -> (i32, i32, i32) {
    %c0_i32 = arith.constant 0 : i32
    %c0_i32_0 = arith.constant 0 : i32
    %c0_i32_1 = arith.constant 0 : i32
    return %arg0, %c0_i32, %c0_i32_0 : i32, i32, i32
  }
  func.func @transform_3(%arg0: i32, %arg1: i32) -> (i32, i32, i32) {
    %c0_i32 = arith.constant 0 : i32
    %c0_i32_0 = arith.constant 0 : i32
    %c0_i32_1 = arith.constant 0 : i32
    return %arg0, %c0_i32, %c0_i32_0 : i32, i32, i32
  }
  func.func @transform_4(%arg0: i32, %arg1: i32) -> (i32, i32, i32) {
    %c0_i32 = arith.constant 0 : i32
    %c0_i32_0 = arith.constant 0 : i32
    %c0_i32_1 = arith.constant 0 : i32
    return %arg0, %c0_i32, %c0_i32_0 : i32, i32, i32
  }
  func.func @transform_5(%arg0: i32, %arg1: i32) -> (i32, i32, i32) {
    %c0_i32 = arith.constant 0 : i32
    %c0_i32_0 = arith.constant 0 : i32
    %c0_i32_1 = arith.constant 0 : i32
    return %arg0, %c0_i32, %c0_i32_0 : i32, i32, i32
  }
  func.func @transform_6(%arg0: i32, %arg1: i32) -> (i32, i32, i32) {
    %c0_i32 = arith.constant 0 : i32
    %c0_i32_0 = arith.constant 0 : i32
    %c0_i32_1 = arith.constant 0 : i32
    return %arg0, %c0_i32, %c0_i32_0 : i32, i32, i32
  }
  func.func @transform_7(%arg0: i32, %arg1: i32) -> (i32, i32, i32) {
    %c0_i32 = arith.constant 0 : i32
    %c0_i32_0 = arith.constant 0 : i32
    return %arg0, %arg1, %c0_i32 : i32, i32, i32
  }
}

</mosaic_0001>

<bundles_post_ra>
// kernel: tpu_custom_call.1
= control target key start
LH: loop header
LB: loop body
LE: loop exit
PB: predicated region body
PF: predicated region fallthrough
CT: control target
= control target key end

     0   :  { %s1808_s0 = inlined_call_operand.hbm [shape: f32[3,16,128], index: 0, kind: input, shape index: {}]   ;;  %s1809_s1 = inlined_call_operand.hbm [shape: bf16[3,128,128], index: 1, kind: input, shape index: {}]   ;;  %s1810_s2 = inlined_call_operand.vmem [shape: f32[3,1,128], index: 2, kind: input, shape index: {}]   ;;  %s1811_s3 = inlined_call_operand.hbm [shape: bf16[3,128,128], index: 3, kind: input, shape index: {}]   ;;  %s1812_s4 = inlined_call_operand.vmem [shape: f32[3,1,128], index: 4, kind: input, shape index: {}]   ;;  %s1813_s5 = inlined_call_operand.hbm [shape: bf16[3,128,128], index: 5, kind: input, shape index: {}]   ;;  %s1814_s6 = inlined_call_operand.vmem [shape: f32[3,1,128], index: 6, kind: input, shape index: {}]   ;;  %s1815_s7 = inlined_call_operand.hbm [shape: f32[3,16,128], index: 7, kind: output, shape index: {}]  }
   0x1   :  { %1822 = sst [smem:[#allocation16_spill]] %s1809_s1 }
   0x2   :  { %12 = vsyncpa [#allocation3], 0 }
   0x3   :  { %14 = vsyncpa [#allocation3 + $0x1], 0 }
   0x4   :  { %15 = vsyncpa [#allocation6], 0 }
   0x5   :  { %16 = vsyncpa [#allocation9], 0 }
   0x6   :  { %17 = vsyncpa [#allocation4], 0 }
   0x7   :  { %19 = vsyncpa [#allocation4 + $0x1], 0  ;;  %s1467_s24 = smov 0   ;;  %s1469_s25 = smov 0  }
   0x8   :  { %s1471_s26 = smov 0   ;;  %s1473_s27 = smov 0  }
   0x9   :  { %s1475_s28 = smov 0   ;;  %s1477_s29 = smov 0  }
   0xa LB: > { %s949_s30 = sadd.s32 4294967295, %s1412_s29   ;;  %s950_s8 = sadd.s32 4294967294, %s1412_s29   ;;  %s1412_s29 = sphi %s1477_s29, %s25_s29   ;;  %s1408_s28 = sphi %s1475_s28, %s1845_s28   ;;  %s1404_s27 = sphi %s1473_s27, %s1844_s27   ;;  %s1400_s26 = sphi %s1471_s26, %s1843_s26   ;;  %s1396_s25 = sphi %s1469_s25, %s1842_s25   ;;  %s1392_s24 = sphi %s1467_s24, %s1841_s24  }
   0xb   : > { %p59_p0 = scmp.ne.s32.totalorder %s1396_s25, %s1392_s24  ;;  %p60_p1 = scmp.eq.s32.totalorder %s949_s30, 0 }
   0xc   : > { %p1501_p2 = scmp.eq.s32.totalorder %s949_s30, 2  ;;  %p247_p3 = scmp.eq.s32.totalorder %s950_s8, 2 }
   0xd   : > { %p1505_p4 = por %p60_p1, %p59_p0  ;;  %p951_p5 = scmp.ge.s32.totalorder %s1412_s29, 1 }
   0xe   : > { %s1823_s9 = scalar_select %p1501_p2, 1, 0 }
   0xf   : > { %s1824_s10 = scalar_select %p1505_p4, 1, 0 }
  0x10   : > { %p1510_p6 = por %p247_p3, %p59_p0  ;;  %p254_p7 = scmp.lt.s32.totalorder %s1412_s29, 4 }
  0x11   : > { %s997_s12 = sshll.u32 %s1404_s27, 10  ;;  %s1828_s1 = sld [smem:[#allocation16_spill]] }
  0x12   : > { %s1825_s11 = scalar_select %p1510_p6, 1, 0 }
  0x13   : > { %p1516_p8 = pnand %p951_p5, %p254_p7  ;;  %s1414_s17 = smov [#allocation5]  }
  0x14   : > { %1826 = sst [smem:[#allocation15_spill]] %s1825_s11  ;;  %s269_s18 = sshll.u32 %s1414_s17, 4  ;;  %s1527_s18 = int_to_ptr.vmem [resolvable:$true] %s269_s18 }
  0x15   : > { %s1827_s13 = scalar_select %p1516_p8, 1, 0 }
  0x16   : > { %p1099_p9 = pneg %p1516_p8  ;;  %s1538_s22 = scalar_lea.hbm %s1811_s3, %s997_s12 }
  0x17   : > { %s1523_s16 = scalar_lea.hbm %s1828_s1, %s997_s12  ;;  %s1543_s8 = scalar_lea.hbm %s1813_s5, %s997_s12 }
  0x18   : > { %p1531_p10 = pnand %p1099_p9, %p1505_p4  ;;  %s1415_s14 = smov [#allocation7]  }
  0x19   : > { %s1545_s15 = sshll.u32 %s1415_s14, 4  ;;  %s1202_s17 = scalar_lea.hbm %s1523_s16, 1024  ;;  %s292_s15 = int_to_ptr.vmem [resolvable:$true] %s1545_s15 }
  0x1a   : > { %s1829_s19 = scalar_select %p1531_p10, 1, 0 }
  0x1b   : > { %p1203_p11 = scmp.ne.s32.totalorder %s1523_s16, %s1202_s17  ;;  %p1551_p12 = pneg %p1531_p10 }
  0x1c   : > { %s1207_s23 = scalar_lea.hbm %s1828_s1, 3072  ;;  %p1208_p1 = scmp.lt.u32.totalorder %s1523_s16, %s1828_s1 }
  0x1d   : > { %p1205_p13 = pnand %p1551_p12, %p1203_p11  ;;  %p1209_p3 = scmp.lt.u32.totalorder %s1207_s23, %s1202_s17 }
  0x1e   : > { %p1211_p7 = scmp.lt.u32.totalorder %s1202_s17, %s1523_s16 }
  0x1f   : > { %p1206_p0 = pneg %p1205_p13  ;;  %p1210_p5 = por %p1209_p3, %p1208_p1 }
  0x21   : > { %p1212_p9 = por %p1211_p7, %p1210_p5 }
  0x23   : > { %p1213_p6 = pnand %p1212_p9, %p1206_p0 }
  0x25   : > { %1216 = shalt.err (!%p1213_p6)
}
  0x26   : > { %s1217_s14 = scalar_lea.vmem %s1527_s18, 1024  ;;  %p1225_p8 = scmp.lt.s32.totalorder %s1527_s18, %s1527_s18 }
  0x27   : > { %p1218_p11 = scmp.ne.s32.totalorder %s1527_s18, %s1217_s14  ;;  %p1226_p2 = scmp.lt.s32.totalorder %s1217_s14, %s1217_s14 }
  0x29   : > { %p1220_p13 = pnand %p1218_p11, %p1551_p12  ;;  %p1227_p10 = por %p1226_p2, %p1225_p8 }
  0x2b   : > { %p1221_p4 = pneg %p1220_p13 }
  0x2d   : > { %p1228_p1 = pnand %p1227_p10, %p1221_p4 }
  0x2f   : > { %1231 = shalt.err (!%p1228_p1)
}
  0x30   : > { %s1416_s20 = smov 64   ;;  %s1417_s17 = smov 4  }
  0x31   : > { %p1831_p6 = scmp.ne.s32.totalorder %s1829_s19, 0  ;;  %s1232_s21 = scalar_lea.hbm %s1538_s22, 1024 }
  0x32   : > { %p1233_p2 = scmp.ne.s32.totalorder %s1538_s22, %s1232_s21  ;;  %s1237_s30 = scalar_lea.hbm %s1811_s3, 3072 }
  0x33   : > { %1102 = dma.hbm_to_vmem [thread:$0]  (!%p1831_p6), %s1523_s16, 1024, %s1527_s18, [#allocation6], %s1416_s20, %s1416_s20, %s1417_s17  }
  0x34   : > { %p1235_p4 = pnand %p1233_p2, %p1551_p12  ;;  %p1238_p10 = scmp.lt.u32.totalorder %s1538_s22, %s1811_s3 }
  0x35   : > { %p1239_p0 = scmp.lt.u32.totalorder %s1237_s30, %s1232_s21  ;;  %p1241_p5 = scmp.lt.u32.totalorder %s1232_s21, %s1538_s22 }
  0x36   : > { %p1236_p8 = pneg %p1235_p4 }
  0x37   : > { %p1240_p3 = por %p1239_p0, %p1238_p10 }
  0x39   : > { %p1242_p7 = por %p1241_p5, %p1240_p3 }
  0x3b   : > { %p1243_p9 = pnand %p1242_p7, %p1236_p8 }
  0x3d   : > { %1246 = shalt.err (!%p1243_p9)
}
  0x3e   : > { %s1247_s16 = scalar_lea.vmem %s292_s15, 1024  ;;  %p1255_p2 = scmp.lt.s32.totalorder %s292_s15, %s292_s15 }
  0x3f   : > { %p1248_p11 = scmp.ne.s32.totalorder %s292_s15, %s1247_s16  ;;  %p1256_p4 = scmp.lt.s32.totalorder %s1247_s16, %s1247_s16 }
  0x41   : > { %p1250_p13 = pnand %p1248_p11, %p1551_p12  ;;  %p1257_p6 = por %p1256_p4, %p1255_p2 }
  0x43   : > { %p1251_p1 = pneg %p1250_p13 }
  0x45   : > { %p1258_p0 = pnand %p1257_p6, %p1251_p1 }
  0x47   : > { %1261 = shalt.err (!%p1258_p0)
}
  0x48   : > { %p1832_p10 = scmp.ne.s32.totalorder %s1829_s19, 0  ;;  %s1418_s1 = smov [#allocation8]  }
  0x49   : > { %s313_s18 = sshll.u32 %s1418_s1, 4  ;;  %s1262_s21 = scalar_lea.hbm %s1543_s8, 1024  ;;  %s314_s18 = int_to_ptr.vmem [resolvable:$true] %s313_s18 }
  0x4a   : > { %1105 = dma.hbm_to_vmem [thread:$0]  (!%p1832_p10), %s1538_s22, 1024, %s292_s15, [#allocation6], %s1416_s20, %s1416_s20, %s1417_s17  }
  0x4b   : > { %p1263_p8 = scmp.ne.s32.totalorder %s1543_s8, %s1262_s21  ;;  %s1267_s30 = scalar_lea.hbm %s1813_s5, 3072 }
  0x4c   : > { %p1268_p5 = scmp.lt.u32.totalorder %s1543_s8, %s1813_s5  ;;  %p1269_p7 = scmp.lt.u32.totalorder %s1267_s30, %s1262_s21 }
  0x4d   : > { %p1265_p6 = pnand %p1263_p8, %p1551_p12  ;;  %p1271_p11 = scmp.lt.u32.totalorder %s1262_s21, %s1543_s8 }
  0x4e   : > { %p1270_p9 = por %p1269_p7, %p1268_p5 }
  0x4f   : > { %p1266_p3 = pneg %p1265_p6 }
  0x50   : > { %p1272_p13 = por %p1271_p11, %p1270_p9 }
  0x52   : > { %p1273_p1 = pnand %p1272_p13, %p1266_p3 }
  0x54   : > { %1276 = shalt.err (!%p1273_p1)
}
  0x55   : > { %s1277_s22 = scalar_lea.vmem %s314_s18, 1024  ;;  %p1285_p8 = scmp.lt.s32.totalorder %s314_s18, %s314_s18 }
  0x56   : > { %p1278_p2 = scmp.ne.s32.totalorder %s314_s18, %s1277_s22  ;;  %p1286_p6 = scmp.lt.s32.totalorder %s1277_s22, %s1277_s22 }
  0x58   : > { %p1280_p4 = pnand %p1278_p2, %p1551_p12  ;;  %p1287_p10 = por %p1286_p6, %p1285_p8 }
  0x5a   : > { %p1281_p0 = pneg %p1280_p4 }
  0x5c   : > { %p1288_p5 = pnand %p1287_p10, %p1281_p0 }
  0x5e   : > { %1291 = shalt.err (!%p1288_p5)
}
  0x5f   : > { %p1833_p7 = scmp.ne.s32.totalorder %s1829_s19, 0  ;;  %s37_s11 = sadd.s32 1, %s1408_s28 }
  0x60   : > { %s46_s15 = sadd.s32 1, %s1400_s26  ;;  %p39_p12 = scmp.ge.s32.totalorder %s37_s11, 3 }
  0x61   : > { %1108 = dma.hbm_to_vmem [thread:$0]  (!%p1833_p7), %s1543_s8, 1024, %s314_s18, [#allocation9], %s1416_s20, %s1416_s20, %s1417_s17  }
  0x62   : > { %p53_p10 = scmp.ne.s32.totalorder %s1400_s26, %s1396_s25  ;;  %p54_p3 = scmp.eq.s32.totalorder %s1412_s29, 0 }
  0x63   : > { %p1117_p9 = scmp.lt.s32.totalorder %s1412_s29, 3  ;;  %s1847_s11 = smov (%p39_p12, %s37_s11), 0 }
  0x64   : > { %p55_p11 = por %p54_p3, %p53_p10  ;;  %p1834_p13 = scmp.ne.s32.totalorder %s1823_s9, 0 }
  0x65   : > { %s41_s1 = ssub.s32 %s1408_s28, %s1847_s11  ;;  %s333_s21 = sand.u32 1, %s1400_s26  }
  0x66   : > { %p1629_p1 = por %p1834_p13, %p53_p10  ;;  %p44_p2 = scmp.eq.s32.totalorder %s41_s1, 0 }
  0x67   : > { %s959_s8 = sshll.u32 %s333_s21, 4  ;;  %s1000_s20 = sshll.u32 %s1408_s28, 8 }
  0x68   : > { %s1638_s17 = scalar_select %p44_p2, %s1400_s26, %s46_s15  }
  0x69   : > { %s1643_s12 = scalar_lea.hbm %s1808_s0, %s1000_s20  ;;  %s337_s9 = scalar_lea.vmem [#allocation2], %s959_s8 }
  0x6a   : > { %s346_s30 = sshll.u32 %s337_s9, 4  ;;  %p1647_p4 = pnand %p1117_p9, %p55_p11  ;;  %s1651_s30 = int_to_ptr.vmem [resolvable:$true] %s346_s30 }
  0x6b   : > { %s1653_s16 = scalar_lea.sflag [#allocation3], %s333_s21  ;;  %s1292_s22 = scalar_lea.hbm %s1643_s12, 256 }
  0x6c   : > { %p1293_p0 = scmp.ne.s32.totalorder %s1643_s12, %s1292_s22  ;;  %p1294_p8 = pneg %p1647_p4 }
  0x6d   : > { %s1297_s8 = scalar_lea.hbm %s1808_s0, 768  ;;  %p1298_p7 = scmp.lt.u32.totalorder %s1643_s12, %s1808_s0 }
  0x6e   : > { %p1295_p6 = pnand %p1294_p8, %p1293_p0  ;;  %p1299_p12 = scmp.lt.u32.totalorder %s1297_s8, %s1292_s22 }
  0x6f   : > { %p1301_p3 = scmp.lt.u32.totalorder %s1292_s22, %s1643_s12 }
  0x70   : > { %p1296_p5 = pneg %p1295_p6  ;;  %p1300_p10 = por %p1299_p12, %p1298_p7 }
  0x72   : > { %p1302_p9 = por %p1301_p3, %p1300_p10 }
  0x74   : > { %p1303_p11 = pnand %p1302_p9, %p1296_p5 }
  0x76   : > { %1306 = shalt.err (!%p1303_p11)
}
  0x77   : > { %s1307_s21 = scalar_lea.vmem %s1651_s30, 256  ;;  %s1419_s23 = smov [#allocation2]  }
  0x78   : > { %p1308_p13 = scmp.ne.s32.totalorder %s1651_s30, %s1307_s21  ;;  %s1312_s9 = sshll.u32 %s1419_s23, 4  ;;  %s1313_s9 = int_to_ptr.vmem [resolvable:$false] %s1312_s9 }
  0x79   : > { %s1314_s15 = scalar_lea.vmem %s1313_s9, 512  ;;  %p1315_p6 = scmp.lt.s32.totalorder %s1651_s30, %s1313_s9 }
  0x7a   : > { %p1310_p2 = pnand %p1308_p13, %p1294_p8  ;;  %p1316_p7 = scmp.lt.s32.totalorder %s1314_s15, %s1307_s21 }
  0x7c   : > { %p1311_p0 = pneg %p1310_p2  ;;  %p1317_p12 = por %p1316_p7, %p1315_p6 }
  0x7e   : > { %p1318_p10 = pnand %p1317_p12, %p1311_p0 }
  0x80   : > { %1321 = shalt.err (!%p1318_p10)
}
  0x81   : > { %s1420_s22 = smov 128   ;;  %s1421_s1 = smov 8  }
  0x82   : > { %1112 = dma.hbm_to_vmem [thread:$0]  (!%p1647_p4), %s1643_s12, 256, %s1651_s30, %s1653_s16, %s1420_s22, %s1420_s22, %s1421_s1  }
  0x83   : > { %p1837_p8 = scmp.ne.s32.totalorder %s1827_s13, 0 }
  0x84   : > { %s1684_s8 = sand.u32 (!%p1837_p8), 1, %s1396_s25   ;;  %p1838_p5 = scmp.ne.s32.totalorder (!%p1837_p8), %s1824_s10, 0 }
  0x85   : > { %358 = sbr.rel (%p1837_p8) target bundleno = 850 (0x352), region = 48  ;;  %s963_s20 = sshll.u32 (!%p1837_p8), %s1684_s8, 4 }
  0x86   : > { %s361_s18 = scalar_lea.sflag (!%p1837_p8), [#allocation3], %s1684_s8  ;;  %s1690_s21 = scalar_lea.vmem (!%p1837_p8), [#allocation2], %s963_s20 }
  0x8c   : > { %1375 = dma.done.wait (%p1838_p5), %s361_s18, 256  }
  0x8d   : > { %1377 = vsyncadd (%p1838_p5), %s361_s18, 4294967040 }
  0x8e   : > { %1379 = dma.done.wait (%p1838_p5), [#allocation6], 2048  }
  0x8f   : > { %1381 = vsyncadd (%p1838_p5), [#allocation6], 4294965248 }
  0x90   : > { %1383 = dma.done.wait (%p1838_p5), [#allocation9], 1024  }
  0x91   : > { %1385 = vsyncadd (%p1838_p5), [#allocation9], 4294966272  ;;  %v1422_v0 = vmov 0.0   ;;  %vm1423_vm0 = vmmov 0   ;;  %v1178_v1 = vld [vmem:[#allocation5] sm:$0xff]   ;;  %v1179_v2 = vld [vmem:[#allocation5 + $0x8] sm:$0xff]  }
  0x92   : > { %1029 = vmatprep.subr.bf16.mxu0 %v1422_v0  ;;  %1045 = vmatprep.mubr.msk.bf16.mxu0 %vm1423_vm0, %v1422_v0  ;;  %v1180_v3 = vld [vmem:[#allocation5 + $0x10] sm:$0xff]   ;;  %v1186_v4 = vld [vmem:[#allocation7] sm:$0xff]   ;;  %v1181_v5 = vld [vmem:[#allocation5 + $0x18] sm:$0xff]   ;;  %p417_p4 = scmp.lt.s32.totalorder %s1404_s27, 2  ;;  %s415_s1 = scalar_lea.vmem [#allocation10], %s963_s20 }
  0x93   : > { %1049 = vmatprep.subr.bf16.mxu1 %v1422_v0  ;;  %1065 = vmatprep.mubr.msk.bf16.mxu1 %vm1423_vm0, %v1422_v0  ;;  %v1187_v6 = vld [vmem:[#allocation7 + $0x8] sm:$0xff]   ;;  %v1182_v7 = vld [vmem:[#allocation5 + $0x20] sm:$0xff]   ;;  %v1188_v8 = vld [vmem:[#allocation7 + $0x10] sm:$0xff]   ;;  %s791_s18 = sshll.u32 %s415_s1, 4  ;;  %s776_s20 = scalar_lea.sflag [#allocation4], %s1684_s8  ;;  %s1755_s18 = int_to_ptr.vmem [resolvable:$true] %s791_s18 }
  0x94   : > { %1030 = vmatpush3.bf16.msra.mxu0 %v1178_v1  ;;  %1050 = vmatpush3.bf16.msra.mxu1 %v1186_v4  ;;  %v1183_v9 = vld [vmem:[#allocation5 + $0x28] sm:$0xff]   ;;  %v1189_v10 = vld [vmem:[#allocation7 + $0x18] sm:$0xff]   ;;  %v1184_v11 = vld [vmem:[#allocation5 + $0x30] sm:$0xff]   ;;  %s1737_s10 = scalar_select %p417_p4, %s1404_s27, 2 }
  0x95   : > { %1031 = vmatprep.subr.bf16.mxu0 %v1422_v0  ;;  %1051 = vmatprep.subr.bf16.mxu1 %v1422_v0  ;;  %v1190_v12 = vld [vmem:[#allocation7 + $0x20] sm:$0xff]   ;;  %v1185_v13 = vld [vmem:[#allocation5 + $0x38] sm:$0xff]   ;;  %v1191_v16 = vld [vmem:[#allocation7 + $0x28] sm:$0xff]  }
  0x96   : > { %v428_v14 = vld [vmem:[%s1690_s21] sm:$0xff]  ;;  %v429_v15 = vld [vmem:[%s1690_s21 + $0x8] sm:$0xff]  ;;  %s419_s30 = scalar_lea.vmem %s1810_s2, %s1737_s10  ;;  %s422_s23 = scalar_lea.vmem %s1812_s4, %s1737_s10 }
  0x97   : > { %v447_v17 = vpack.c.bf16 %v429_v15, %v428_v14  ;;  %v1192_v18 = vld [vmem:[#allocation7 + $0x30] sm:$0xff]   ;;  %v1193_v19 = vld [vmem:[#allocation7 + $0x38] sm:$0xff]   ;;  %v1194_v20 = vld [vmem:[#allocation8] sm:$0xff]   ;;  %s425_s22 = scalar_lea.vmem %s1814_s6, %s1737_s10  ;;  %s1001_s21 = sshll.u32 %s1404_s27, 8 }
  0x98   : > { %1032 = vmatpush3.bf16.msra.mxu0 %v1179_v2  ;;  %1052 = vmatpush3.bf16.msra.mxu1 %v1187_v6  ;;  %v1195_v21 = vld [vmem:[#allocation8 + $0x8] sm:$0xff]   ;;  %v1196_v22 = vld [vmem:[#allocation8 + $0x10] sm:$0xff]   ;;  %v1197_v23 = vld [vmem:[#allocation8 + $0x18] sm:$0xff]   ;;  %s1322_s27 = scalar_lea.vmem %s1755_s18, 256  ;;  %s1424_s10 = smov [#allocation10]  }
  0x99   : > { %1033 = vmatprep.subr.bf16.mxu0 %v1422_v0  ;;  %1053 = vmatprep.subr.bf16.mxu1 %v1422_v0  ;;  %v1198_v24 = vld [vmem:[#allocation8 + $0x20] sm:$0xff]   ;;  %v1199_v25 = vld [vmem:[#allocation8 + $0x28] sm:$0xff]   ;;  %v1200_v36 = vld [vmem:[#allocation8 + $0x30] sm:$0xff]   ;;  %p1323_p3 = scmp.ne.s32.totalorder %s1755_s18, %s1322_s27  ;;  %s1326_s14 = sshll.u32 %s1424_s10, 4  ;;  %s1327_s14 = int_to_ptr.vmem [resolvable:$false] %s1326_s14 }
  0x9a   : > { %v965_v26 = vld [vmem:[%s419_s30] ss:$0 sm:$0xff]  ;;  %v1201_v37 = vld [vmem:[#allocation8 + $0x38] sm:$0xff]   ;;  %s1760_s30 = scalar_lea.hbm %s1815_s7, %s1001_s21  ;;  %s1328_s16 = scalar_lea.vmem %s1327_s14, 512 }
  0x9b   : > { %v974_v38 = vld [vmem:[%s422_s23] ss:$0 sm:$0xff]  ;;  %p1324_p9 = pnand %p1323_p3, %p1629_p1  ;;  %p1329_p13 = scmp.lt.s32.totalorder %s1755_s18, %s1327_s14 }
  0x9c   : > { %1034 = vmatpush3.bf16.msra.mxu0 %v1180_v3  ;;  %1054 = vmatpush3.bf16.msra.mxu1 %v1188_v8  ;;  %v983_v48 = vld [vmem:[%s425_s22] ss:$0 sm:$0xff]  ;;  %p1330_p2 = scmp.lt.s32.totalorder %s1328_s16, %s1322_s27 }
  0x9d   : > { %1035 = vmatprep.subr.bf16.mxu0 %v1422_v0  ;;  %1055 = vmatprep.subr.bf16.mxu1 %v1422_v0  ;;  %p1325_p11 = pneg %p1324_p9 }
  0x9e   : > { %p1331_p0 = por %p1330_p2, %p1329_p13 }
  0xa0   : > { %1036 = vmatpush3.bf16.msra.mxu0 %v1181_v5  ;;  %1056 = vmatpush3.bf16.msra.mxu1 %v1189_v10  ;;  %p1332_p6 = pnand %p1331_p0, %p1325_p11 }
  0xa1   : > { %1037 = vmatprep.subr.bf16.mxu0 %v1422_v0  ;;  %1057 = vmatprep.subr.bf16.mxu1 %v1422_v0 }
  0xa4   : > { %1038 = vmatpush3.bf16.msra.mxu0 %v1182_v7  ;;  %1058 = vmatpush3.bf16.msra.mxu1 %v1190_v12 }
  0xa5   : > { %1039 = vmatprep.subr.bf16.mxu0 %v1422_v0  ;;  %1059 = vmatprep.subr.bf16.mxu1 %v1422_v0 }
  0xa8   : > { %1040 = vmatpush3.bf16.msra.mxu0 %v1183_v9  ;;  %1060 = vmatpush3.bf16.msra.mxu1 %v1191_v16 }
  0xa9   : > { %1041 = vmatprep.subr.bf16.mxu0 %v1422_v0  ;;  %1061 = vmatprep.subr.bf16.mxu1 %v1422_v0 }
  0xac   : > { %1042 = vmatpush3.bf16.msra.mxu0 %v1184_v11  ;;  %1062 = vmatpush3.bf16.msra.mxu1 %v1192_v18 }
  0xad   : > { %1043 = vmatprep.subr.bf16.mxu0 %v1422_v0  ;;  %1063 = vmatprep.subr.bf16.mxu1 %v1422_v0 }
  0xb0   : > { %1044 = vmatpush3.bf16.msra.mxu0 %v1185_v13  ;;  %1064 = vmatpush3.bf16.msra.mxu1 %v1193_v19 }
  0xb1   : > { %1069 = vmatprep.subr.bf16.mxu0 %v1422_v0 }
  0xb3   : > { %1046 = vmatmul.mubr.bf16.vlgmr.msra.gmra.mrb[0].mxu0 %v447_v17 }
  0xb4   : > { %1085 = vmatprep.mubr.msk.bf16.mxu0 %vm1423_vm0, %v1422_v0  ;;  %1070 = vmatpush3.bf16.msra.mxu0 %v1194_v20 }
  0xb5   : > { %1071 = vmatprep.subr.bf16.mxu0 %v1422_v0 }
  0xb8   : > { %1072 = vmatpush3.bf16.msra.mxu0 %v1195_v21 }
  0xb9   : > { %1073 = vmatprep.subr.bf16.mxu0 %v1422_v0 }
  0xbc   : > { %1074 = vmatpush3.bf16.msra.mxu0 %v1196_v22 }
  0xbd   : > { %1075 = vmatprep.subr.bf16.mxu0 %v1422_v0 }
  0xc0   : > { %1076 = vmatpush3.bf16.msra.mxu0 %v1197_v23 }
  0xc1   : > { %1077 = vmatprep.subr.bf16.mxu0 %v1422_v0 }
  0xc4   : > { %1078 = vmatpush3.bf16.msra.mxu0 %v1198_v24 }
  0xc5   : > { %1079 = vmatprep.subr.bf16.mxu0 %v1422_v0 }
  0xc8   : > { %1080 = vmatpush3.bf16.msra.mxu0 %v1199_v25 }
  0xc9   : > { %1081 = vmatprep.subr.bf16.mxu0 %v1422_v0 }
  0xcc   : > { %1082 = vmatpush3.bf16.msra.mxu0 %v1200_v36 }
  0xcd   : > { %1083 = vmatprep.subr.bf16.mxu0 %v1422_v0 }
  0xd0   : > { %1084 = vmatpush3.bf16.msra.mxu0 %v1201_v37 }
 0x186   : > { %v536_v27 = vpop.f32.mrb[0].mxu0 }
 0x187   : > { %v537_v28 = vadd.f32 %v965_v26, %v536_v27  ;;  %v1047_v29 = vpop.f32.mrb[1].mxu0 }
 0x188   : > { %v539_v30 = vpop.f32.mrb[2].mxu0 }
 0x189   : > { %v540_v31 = vadd.f32 %v965_v26, %v539_v30  ;;  %v1048_v32 = vpop.f32.mrb[3].mxu0  ;;  %v543_v33 = vmax.f32 %v537_v28, 0.0 }
 0x18b   : > { %v544_v34 = vmax.f32 %v540_v31, 0.0 }
 0x18d   : > { %v562_v35 = vpack.c.bf16 %v544_v34, %v543_v33 }
 0x18f   : > { %1066 = vmatmul.mubr.bf16.vlgmr.msra.gmra.mrb[0].mxu1 %v562_v35 }
 0x262   : > { %v651_v39 = vpop.f32.mrb[0].mxu1 }
 0x263   : > { %v652_v40 = vadd.f32 %v974_v38, %v651_v39  ;;  %v1067_v41 = vpop.f32.mrb[1].mxu1 }
 0x264   : > { %v654_v42 = vpop.f32.mrb[2].mxu1 }
 0x265   : > { %v655_v43 = vadd.f32 %v974_v38, %v654_v42  ;;  %v1068_v44 = vpop.f32.mrb[3].mxu1  ;;  %v658_v45 = vmax.f32 %v652_v40, 0.0 }
 0x267   : > { %v659_v46 = vmax.f32 %v655_v43, 0.0 }
 0x269   : > { %v677_v47 = vpack.c.bf16 %v659_v46, %v658_v45 }
 0x26b   : > { %1086 = vmatmul.mubr.bf16.vlgmr.msra.gmra.mrb[4].mxu0 %v677_v47 }
 0x33e   : > { %v766_v49 = vpop.f32.mrb[4].mxu0 }
 0x33f   : > { %v767_v50 = vadd.f32 %v983_v48, %v766_v49  ;;  %v1087_v51 = vpop.f32.mrb[5].mxu0 }
 0x340   : > { %v769_v52 = vpop.f32.mrb[6].mxu0 }
 0x341   : > { %773 = vst [vmem:[%s415_s1] sm:$0xff] %v767_v50  ;;  %v770_v53 = vadd.f32 %v983_v48, %v769_v52  ;;  %v1088_v54 = vpop.f32.mrb[7].mxu0 }
 0x343   : > { %774 = vst [vmem:[%s415_s1 + $0x8] sm:$0xff] %v770_v53 }
 0x344   : > { %1335 = shalt.err (!%p1332_p6)
}
 0x345   : > { %s1336_s23 = scalar_lea.hbm %s1760_s30, 256  ;;  %s1340_s22 = scalar_lea.hbm %s1815_s7, 768 }
 0x346   : > { %p1337_p7 = scmp.ne.s32.totalorder %s1760_s30, %s1336_s23  ;;  %p1341_p8 = scmp.lt.u32.totalorder %s1760_s30, %s1815_s7 }
 0x347   : > { %p1342_p5 = scmp.lt.u32.totalorder %s1340_s22, %s1336_s23  ;;  %p1344_p3 = scmp.lt.u32.totalorder %s1336_s23, %s1760_s30 }
 0x348   : > { %p1338_p12 = pnand %p1337_p7, %p1629_p1 }
 0x349   : > { %p1343_p4 = por %p1342_p5, %p1341_p8 }
 0x34a   : > { %p1339_p10 = pneg %p1338_p12 }
 0x34b   : > { %p1345_p9 = por %p1344_p3, %p1343_p4 }
 0x34d   : > { %p1346_p11 = pnand %p1345_p9, %p1339_p10 }
 0x34f   : > { %1349 = shalt.err (!%p1346_p11)
}
 0x350   : > { %s1425_s13 = smov 128   ;;  %s1426_s12 = smov 8  }
 0x351   : > { %1097 = dma.vmem_to_hbm [thread:$0]  (%p1629_p1), %s1755_s18, 256, %s1760_s30, %s776_s20, %s1425_s13, %s1425_s13, %s1426_s12  }
 0x352 PF: > { %s1839_s27 = sld [smem:[#allocation15_spill]]  ;;  %p1118_p13 = scmp.ge.s32.totalorder %s1412_s29, 2 }
 0x353   : > { %s806_s10 = sand.u32 1, %s1392_s24  }
 0x354   : > { %s807_s14 = scalar_lea.sflag [#allocation4], %s806_s10 }
 0x358   : > { %p1840_p2 = scmp.ne.s32.totalorder %s1839_s27, 0 }
 0x35a   : > { %p1114_p0 = pnand %p1118_p13, %p1840_p2 }
 0x35c   : > { %1387 = dma.done.wait (!%p1114_p0), %s807_s14, 256  }
 0x35d   : > { %1389 = vsyncadd (!%p1114_p0), %s807_s14, 4294967040  ;;  %s25_s29 = sadd.s32 1, %s1412_s29   ;;  %s1841_s24 = smov %s1396_s25 }
 0x35e   : > { %p22_p6 = scmp.ge.s32.totalorder %s25_s29, 5   ;;  %s1842_s25 = smov %s1400_s26 }
 0x35f   : > { %s1843_s26 = smov %s1638_s17  ;;  %s1844_s27 = smov %s1408_s28 }
 0x360   : > { %s1845_s28 = smov %s1847_s11  ;;  %24 = sbr.rel (!%p22_p6) target bundleno = 10 (0xa), region = 117 }
 0x367   :  { %812 = vsyncpa [#allocation3], 1 }
 0x368   :  { %814 = vsyncpa [#allocation3 + $0x1], 1 }
 0x369   :  { %815 = vsyncpa [#allocation6], 1 }
 0x36a   :  { %816 = vsyncpa [#allocation9], 1 }
 0x36b   :  { %817 = vsyncpa [#allocation4], 1 }
 0x36c   :  { %819 = vsyncpa [#allocation4 + $0x1], 1 }

// kernel: tpu_custom_call.1
= control target key start
LH: loop header
LB: loop body
LE: loop exit
PB: predicated region body
PF: predicated region fallthrough
CT: control target
= control target key end

     0   :  { %s1934_s0 = inlined_call_operand.hbm [shape: f32[3,16,128], index: 0, kind: input, shape index: {}]   ;;  %s1935_s1 = inlined_call_operand.hbm [shape: bf16[3,128,128], index: 1, kind: input, shape index: {}]   ;;  %s1936_s2 = inlined_call_operand.vmem [shape: f32[3,1,128], index: 2, kind: input, shape index: {}]   ;;  %s1937_s3 = inlined_call_operand.hbm [shape: bf16[3,128,128], index: 3, kind: input, shape index: {}]   ;;  %s1938_s4 = inlined_call_operand.vmem [shape: f32[3,1,128], index: 4, kind: input, shape index: {}]   ;;  %s1939_s5 = inlined_call_operand.hbm [shape: bf16[3,128,128], index: 5, kind: input, shape index: {}]   ;;  %s1940_s6 = inlined_call_operand.vmem [shape: f32[3,1,128], index: 6, kind: input, shape index: {}]   ;;  %s1941_s7 = inlined_call_operand.hbm [shape: f32[3,16,128], index: 7, kind: output, shape index: {}]  }
   0x1   :  { %1953 = sst [smem:[#allocation20_spill]] %s1934_s0 }
   0x2   :  { %1954 = sst [smem:[#allocation21_spill]] %s1935_s1 }
   0x3   :  { %1955 = sst [smem:[#allocation22_spill]] %s1941_s7 }
   0x4   :  { %12 = vsyncpa [#allocation3], 0 }
   0x5   :  { %14 = vsyncpa [#allocation3 + $0x1], 0 }
   0x6   :  { %15 = vsyncpa [#allocation6], 0 }
   0x7   :  { %17 = vsyncpa [#allocation6 + $0x1], 0 }
   0x8   :  { %18 = vsyncpa [#allocation9], 0 }
   0x9   :  { %20 = vsyncpa [#allocation9 + $0x1], 0 }
   0xa   :  { %21 = vsyncpa [#allocation4], 0 }
   0xb   :  { %23 = vsyncpa [#allocation4 + $0x1], 0  ;;  %s1540_s24 = smov 0   ;;  %s1542_s25 = smov 0  }
   0xc   :  { %s1544_s26 = smov 0   ;;  %s1546_s27 = smov 0  }
   0xd   :  { %s1548_s28 = smov 0   ;;  %s1550_s29 = smov 0  }
   0xe LB: > { %1956 = sst [smem:[#allocation15_spill]] %s1465_s24  ;;  %s1571_s30 = sadd.s32 4294967295, %s1485_s29   ;;  %s1485_s29 = sphi %s1550_s29, %s29_s29   ;;  %s1481_s28 = sphi %s1548_s28, %s1985_s28   ;;  %s1477_s27 = sphi %s1546_s27, %s1984_s27   ;;  %s1473_s26 = sphi %s1544_s26, %s1980_s26   ;;  %s1469_s25 = sphi %s1542_s25, %s1983_s25   ;;  %s1465_s24 = sphi %s1540_s24, %s1982_s24  }
   0xf   : > { %1957 = sst [smem:[#allocation16_spill]] %s1473_s26  ;;  %s1021_s8 = sadd.s32 4294967294, %s1485_s29  }
  0x10   : > { %s41_s9 = sadd.s32 1, %s1481_s28  ;;  %s50_s10 = sadd.s32 1, %s1473_s26 }
  0x11   : > { %p43_p0 = scmp.ge.s32.totalorder %s41_s9, 3  ;;  %p57_p1 = scmp.ne.s32.totalorder %s1473_s26, %s1469_s25 }
  0x12   : > { %p58_p2 = scmp.eq.s32.totalorder %s1485_s29, 0  ;;  %p63_p3 = scmp.ne.s32.totalorder %s1469_s25, %s1465_s24 }
  0x13   : > { %s1987_s9 = smov (%p43_p0, %s41_s9), 0  ;;  %p64_p5 = scmp.eq.s32.totalorder %s1571_s30, 0 }
  0x14   : > { %1958 = sst [smem:[#allocation17_spill]] %s1987_s9  ;;  %p1583_p4 = por %p58_p2, %p57_p1 }
  0x15   : > { %s45_s12 = ssub.s32 %s1481_s28, %s1987_s9  ;;  %p245_p6 = scmp.eq.s32.totalorder %s1571_s30, 2 }
  0x16   : > { %p48_p7 = scmp.eq.s32.totalorder %s45_s12, 0  ;;  %p1591_p8 = por %p64_p5, %p63_p3 }
  0x17   : > { %p1595_p9 = por %p245_p6, %p57_p1  ;;  %p251_p10 = scmp.eq.s32.totalorder %s1021_s8, 2 }
  0x18   : > { %s1960_s13 = scalar_select %p1591_p8, 1, 0 }
  0x19   : > { %s1961_s14 = scalar_select %p1595_p9, 1, 0 }
  0x1a   : > { %s1600_s15 = scalar_select %p48_p7, %s1473_s26, %s50_s10  }
  0x1b   : > { %p1602_p11 = por %p251_p10, %p63_p3  ;;  %p1193_p12 = scmp.lt.s32.totalorder %s1485_s29, 3 }
  0x1c   : > { %1962 = sst [smem:[#allocation18_spill]] %s1600_s15  ;;  %s1608_s17 = sand.u32 1, %s1473_s26  }
  0x1d   : > { %s1963_s16 = scalar_select %p1602_p11, 1, 0 }
  0x1e   : > { %s294_s18 = sand.u32 1, %s1485_s29   ;;  %s1612_s19 = sshll.u32 %s1608_s17, 6 }
  0x1f   : > { %1964 = sst [smem:[#allocation19_spill]] %s1963_s16  ;;  %p1616_p13 = pnand %p1193_p12, %p1583_p4 }
  0x20   : > { %s1621_s21 = sshll.u32 %s1481_s28, 10  ;;  %s1966_s1 = sld [smem:[#allocation21_spill]] }
  0x21   : > { %s298_s10 = scalar_lea.vmem [#allocation5], %s1612_s19  ;;  %s1632_s12 = scalar_lea.sflag [#allocation6], %s294_s18 }
  0x22   : > { %s305_s11 = sshll.u32 %s298_s10, 4  ;;  %p1638_p1 = pneg %p1616_p13  ;;  %s1630_s11 = int_to_ptr.vmem [resolvable:$true] %s305_s11 }
  0x26   : > { %s1627_s8 = scalar_lea.hbm %s1966_s1, %s1621_s21  ;;  %s1280_s26 = scalar_lea.hbm %s1966_s1, 3072 }
  0x27   : > { %s1275_s9 = scalar_lea.hbm %s1627_s8, 1024  ;;  %p1281_p4 = scmp.lt.u32.totalorder %s1627_s8, %s1966_s1 }
  0x28   : > { %p1276_p0 = scmp.ne.s32.totalorder %s1627_s8, %s1275_s9  ;;  %p1282_p5 = scmp.lt.u32.totalorder %s1280_s26, %s1275_s9 }
  0x29   : > { %p1284_p7 = scmp.lt.u32.totalorder %s1275_s9, %s1627_s8 }
  0x2a   : > { %p1278_p2 = pnand %p1638_p1, %p1276_p0  ;;  %p1283_p6 = por %p1282_p5, %p1281_p4 }
  0x2c   : > { %p1279_p3 = pneg %p1278_p2  ;;  %p1285_p10 = por %p1284_p7, %p1283_p6 }
  0x2e   : > { %p1286_p12 = pnand %p1285_p10, %p1279_p3 }
  0x30   : > { %1289 = shalt.err (!%p1286_p12)
}
  0x31   : > { %s1290_s18 = scalar_lea.vmem %s1630_s11, 1024  ;;  %s1487_s22 = smov [#allocation5]  }
  0x32   : > { %p1291_p0 = scmp.ne.s32.totalorder %s1630_s11, %s1290_s18  ;;  %s1295_s23 = sshll.u32 %s1487_s22, 4  ;;  %s1296_s23 = int_to_ptr.vmem [resolvable:$false] %s1295_s23 }
  0x33   : > { %s1297_s16 = scalar_lea.vmem %s1296_s23, 2048  ;;  %p1298_p9 = scmp.lt.s32.totalorder %s1630_s11, %s1296_s23 }
  0x34   : > { %p1293_p2 = pnand %p1291_p0, %p1638_p1  ;;  %p1299_p8 = scmp.lt.s32.totalorder %s1297_s16, %s1290_s18 }
  0x36   : > { %p1294_p11 = pneg %p1293_p2  ;;  %p1300_p4 = por %p1299_p8, %p1298_p9 }
  0x38   : > { %p1301_p5 = pnand %p1300_p4, %p1294_p11 }
  0x3a   : > { %1304 = shalt.err (!%p1301_p5)
}
  0x3b   : > { %s1949_s26 = smov 64   ;;  %s1951_s9 = smov 4  }
  0x3c   : > { %1182 = dma.hbm_to_vmem [thread:$0]  (!%p1616_p13), %s1627_s8, 1024, %s1630_s11, %s1632_s12, %s1949_s26, %s1949_s26, %s1951_s9  }
  0x3d   : > { %p1036_p8 = scmp.ge.s32.totalorder %s1485_s29, 1  ;;  %p373_p9 = scmp.lt.s32.totalorder %s1485_s29, 4 }
  0x3e   : > { %s1024_s18 = sshll.u32 %s1608_s17, 4  ;;  %s1074_s22 = sshll.u32 %s1481_s28, 8 }
  0x3f   : > { %p1667_p11 = pnand %p1036_p8, %p373_p9  ;;  %s1969_s0 = sld [smem:[#allocation20_spill]] }
  0x40   : > { %s275_s24 = scalar_lea.vmem [#allocation2], %s1024_s18  ;;  %s272_s8 = scalar_lea.sflag [#allocation3], %s1608_s17 }
  0x41   : > { %s1968_s10 = scalar_select %p1667_p11, 1, 0 }
  0x42   : > { %s284_s7 = sshll.u32 %s275_s24, 4  ;;  %s1678_s7 = int_to_ptr.vmem [resolvable:$true] %s284_s7 }
  0x45   : > { %s1676_s1 = scalar_lea.hbm %s1969_s0, %s1074_s22  ;;  %s1310_s23 = scalar_lea.hbm %s1969_s0, 768 }
  0x46   : > { %s1305_s11 = scalar_lea.hbm %s1676_s1, 256  ;;  %p1311_p10 = scmp.lt.u32.totalorder %s1676_s1, %s1969_s0 }
  0x47   : > { %p1306_p3 = scmp.ne.s32.totalorder %s1676_s1, %s1305_s11  ;;  %p1312_p12 = scmp.lt.u32.totalorder %s1310_s23, %s1305_s11 }
  0x48   : > { %p1314_p2 = scmp.lt.u32.totalorder %s1305_s11, %s1676_s1 }
  0x49   : > { %p1308_p6 = pnand %p1306_p3, %p1638_p1  ;;  %p1313_p0 = por %p1312_p12, %p1311_p10 }
  0x4b   : > { %p1309_p7 = pneg %p1308_p6  ;;  %p1315_p4 = por %p1314_p2, %p1313_p0 }
  0x4d   : > { %p1316_p5 = pnand %p1315_p4, %p1309_p7 }
  0x4f   : > { %1319 = shalt.err (!%p1316_p5)
}
  0x50   : > { %s1320_s24 = scalar_lea.vmem %s1678_s7, 256  ;;  %s1490_s26 = smov [#allocation2]  }
  0x51   : > { %p1321_p8 = scmp.ne.s32.totalorder %s1678_s7, %s1320_s24  ;;  %s1325_s9 = sshll.u32 %s1490_s26, 4  ;;  %s1326_s9 = int_to_ptr.vmem [resolvable:$false] %s1325_s9 }
  0x52   : > { %s1327_s18 = scalar_lea.vmem %s1326_s9, 512  ;;  %p1328_p6 = scmp.lt.s32.totalorder %s1678_s7, %s1326_s9 }
  0x53   : > { %p1323_p9 = pnand %p1321_p8, %p1638_p1  ;;  %p1329_p11 = scmp.lt.s32.totalorder %s1327_s18, %s1320_s24 }
  0x55   : > { %p1324_p3 = pneg %p1323_p9  ;;  %p1330_p10 = por %p1329_p11, %p1328_p6 }
  0x57   : > { %p1331_p12 = pnand %p1330_p10, %p1324_p3 }
  0x59   : > { %1334 = shalt.err (!%p1331_p12)
}
  0x5a   : > { %s1491_s11 = smov 128   ;;  %s1492_s23 = smov 8  }
  0x5b   : > { %1179 = dma.hbm_to_vmem [thread:$0]  (!%p1616_p13), %s1676_s1, 256, %s1678_s7, %s272_s8, %s1491_s11, %s1491_s11, %s1492_s23  }
  0x5c   : > { %s1708_s26 = scalar_lea.hbm %s1937_s3, %s1621_s21  ;;  %s325_s24 = scalar_lea.vmem [#allocation7], %s1612_s19 }
  0x5d   : > { %s332_s9 = sshll.u32 %s325_s24, 4  ;;  %s1335_s18 = scalar_lea.hbm %s1708_s26, 1024  ;;  %s1711_s9 = int_to_ptr.vmem [resolvable:$true] %s332_s9 }
  0x5e   : > { %p1336_p11 = scmp.ne.s32.totalorder %s1708_s26, %s1335_s18  ;;  %s1340_s7 = scalar_lea.hbm %s1937_s3, 3072 }
  0x5f   : > { %p1341_p2 = scmp.lt.u32.totalorder %s1708_s26, %s1937_s3  ;;  %p1342_p4 = scmp.lt.u32.totalorder %s1340_s7, %s1335_s18 }
  0x60   : > { %p1338_p7 = pnand %p1336_p11, %p1638_p1  ;;  %p1344_p8 = scmp.lt.u32.totalorder %s1335_s18, %s1708_s26 }
  0x61   : > { %p1343_p5 = por %p1342_p4, %p1341_p2 }
  0x62   : > { %p1339_p0 = pneg %p1338_p7 }
  0x63   : > { %p1345_p9 = por %p1344_p8, %p1343_p5 }
  0x65   : > { %p1346_p3 = pnand %p1345_p9, %p1339_p0 }
  0x67   : > { %1349 = shalt.err (!%p1346_p3)
}
  0x68   : > { %s1350_s23 = scalar_lea.vmem %s1711_s9, 1024  ;;  %s1493_s0 = smov [#allocation7]  }
  0x69   : > { %p1351_p6 = scmp.ne.s32.totalorder %s1711_s9, %s1350_s23  ;;  %s1355_s22 = sshll.u32 %s1493_s0, 4  ;;  %s1356_s22 = int_to_ptr.vmem [resolvable:$false] %s1355_s22 }
  0x6a   : > { %s1357_s16 = scalar_lea.vmem %s1356_s22, 2048  ;;  %p1358_p11 = scmp.lt.s32.totalorder %s1711_s9, %s1356_s22 }
  0x6b   : > { %p1353_p10 = pnand %p1351_p6, %p1638_p1  ;;  %p1359_p7 = scmp.lt.s32.totalorder %s1357_s16, %s1350_s23 }
  0x6d   : > { %p1354_p12 = pneg %p1353_p10  ;;  %p1360_p2 = por %p1359_p7, %p1358_p11 }
  0x6f   : > { %p1361_p4 = pnand %p1360_p2, %p1354_p12 }
  0x71   : > { %1364 = shalt.err (!%p1361_p4)
}
  0x72   : > { %s1970_s24 = smov 4   ;;  %s1971_s18 = smov 64  }
  0x73   : > { %1185 = dma.hbm_to_vmem [thread:$0]  (!%p1616_p13), %s1708_s26, 1024, %s1711_s9, %s1632_s12, %s1971_s18, %s1971_s18, %s1970_s24  }
  0x74   : > { %s1742_s8 = scalar_lea.hbm %s1939_s5, %s1621_s21  ;;  %s352_s11 = scalar_lea.vmem [#allocation8], %s1612_s19 }
  0x75   : > { %s359_s23 = sshll.u32 %s352_s11, 4  ;;  %s349_s0 = scalar_lea.sflag [#allocation9], %s1608_s17  ;;  %s1745_s23 = int_to_ptr.vmem [resolvable:$true] %s359_s23 }
  0x76   : > { %s1365_s22 = scalar_lea.hbm %s1742_s8, 1024  ;;  %s1370_s9 = scalar_lea.hbm %s1939_s5, 3072 }
  0x77   : > { %p1366_p0 = scmp.ne.s32.totalorder %s1742_s8, %s1365_s22  ;;  %p1371_p9 = scmp.lt.u32.totalorder %s1742_s8, %s1939_s5 }
  0x78   : > { %p1372_p3 = scmp.lt.u32.totalorder %s1370_s9, %s1365_s22  ;;  %p1374_p10 = scmp.lt.u32.totalorder %s1365_s22, %s1742_s8 }
  0x79   : > { %p1368_p5 = pnand %p1366_p0, %p1638_p1 }
  0x7a   : > { %p1373_p6 = por %p1372_p3, %p1371_p9 }
  0x7b   : > { %p1369_p8 = pneg %p1368_p5 }
  0x7c   : > { %p1375_p12 = por %p1374_p10, %p1373_p6 }
  0x7e   : > { %p1376_p11 = pnand %p1375_p12, %p1369_p8 }
  0x80   : > { %1379 = shalt.err (!%p1376_p11)
}
  0x81   : > { %s1380_s19 = scalar_lea.vmem %s1745_s23, 1024  ;;  %s1494_s1 = smov [#allocation8]  }
  0x82   : > { %p1381_p7 = scmp.ne.s32.totalorder %s1745_s23, %s1380_s19  ;;  %s1385_s7 = sshll.u32 %s1494_s1, 4  ;;  %s1386_s7 = int_to_ptr.vmem [resolvable:$false] %s1385_s7 }
  0x83   : > { %s1387_s11 = scalar_lea.vmem %s1386_s7, 2048  ;;  %p1388_p0 = scmp.lt.s32.totalorder %s1745_s23, %s1386_s7 }
  0x84   : > { %p1383_p2 = pnand %p1381_p7, %p1638_p1  ;;  %p1389_p5 = scmp.lt.s32.totalorder %s1387_s11, %s1380_s19 }
  0x86   : > { %p1384_p4 = pneg %p1383_p2  ;;  %p1390_p9 = por %p1389_p5, %p1388_p0 }
  0x88   : > { %p1391_p3 = pnand %p1390_p9, %p1384_p4 }
  0x8a   : > { %1394 = shalt.err (!%p1391_p3)
}
  0x8b   : > { %1188 = dma.hbm_to_vmem [thread:$0]  (!%p1616_p13), %s1742_s8, 1024, %s1745_s23, %s349_s0, %s1971_s18, %s1971_s18, %s1970_s24  }
  0x8c   : > { %p1972_p1 = scmp.ne.s32.totalorder %s1968_s10, 0 }
  0x8d   : > { %s1777_s15 = sand.u32 (!%p1972_p1), 1, %s1469_s25   ;;  %p1973_p8 = scmp.ne.s32.totalorder (!%p1972_p1), %s1960_s13, 0 }
  0x8e   : > { %377 = sbr.rel (%p1972_p1) target bundleno = 861 (0x35d), region = 48  ;;  %s1037_s22 = sshll.u32 (!%p1972_p1), %s1777_s15, 4 }
  0x8f   : > { %s380_s20 = scalar_lea.sflag (!%p1972_p1), [#allocation3], %s1777_s15  ;;  %s1783_s12 = scalar_lea.vmem (!%p1972_p1), [#allocation2], %s1037_s22 }
  0x95   : > { %1448 = dma.done.wait (%p1973_p8), %s380_s20, 256  }
  0x96   : > { %1450 = vsyncadd (%p1973_p8), %s380_s20, 4294967040  ;;  %s388_s17 = sand.u32 1, %s1571_s30   ;;  %s1038_s10 = sshll.u32 %s1777_s15, 6 }
  0x97   : > { %s389_s24 = scalar_lea.sflag [#allocation6], %s388_s17  ;;  %s1791_s18 = scalar_lea.vmem [#allocation5], %s1038_s10 }
  0x98   : > { %1452 = dma.done.wait (%p1973_p8), %s389_s24, 2048  }
  0x99   : > { %1454 = vsyncadd (%p1973_p8), %s389_s24, 4294965248  ;;  %s1797_s8 = scalar_lea.vmem [#allocation7], %s1038_s10  ;;  %s407_s23 = scalar_lea.sflag [#allocation9], %s1777_s15 }
  0x9a   : > { %s1800_s0 = scalar_lea.vmem [#allocation8], %s1038_s10 }
  0x9b   : > { %1456 = dma.done.wait (%p1973_p8), %s407_s23, 1024  }
  0x9c   : > { %1458 = vsyncadd (%p1973_p8), %s407_s23, 4294966272  ;;  %v1495_v0 = vmov 0.0   ;;  %vm1496_vm0 = vmmov 0   ;;  %v1251_v1 = vld [vmem:[%s1791_s18] sm:$0xff]   ;;  %v1252_v2 = vld [vmem:[%s1791_s18 + $0x8] sm:$0xff]   ;;  %p466_p13 = scmp.lt.s32.totalorder %s1477_s27, 2 }
  0x9d   : > { %1106 = vmatprep.subr.bf16.mxu0 %v1495_v0  ;;  %1122 = vmatprep.mubr.msk.bf16.mxu0 %vm1496_vm0, %v1495_v0  ;;  %v1253_v3 = vld [vmem:[%s1791_s18 + $0x10] sm:$0xff]   ;;  %v1259_v4 = vld [vmem:[%s1797_s8] sm:$0xff]   ;;  %v1254_v5 = vld [vmem:[%s1791_s18 + $0x18] sm:$0xff]   ;;  %s464_s20 = scalar_lea.vmem [#allocation10], %s1037_s22  ;;  %s1078_s17 = sshll.u32 %s1477_s27, 8 }
  0x9e   : > { %1126 = vmatprep.subr.bf16.mxu1 %v1495_v0  ;;  %1142 = vmatprep.mubr.msk.bf16.mxu1 %vm1496_vm0, %v1495_v0  ;;  %v1260_v6 = vld [vmem:[%s1797_s8 + $0x8] sm:$0xff]   ;;  %v1255_v7 = vld [vmem:[%s1791_s18 + $0x20] sm:$0xff]   ;;  %v1261_v8 = vld [vmem:[%s1797_s8 + $0x10] sm:$0xff]   ;;  %s1861_s30 = scalar_select %p466_p13, %s1477_s27, 2 }
  0x9f   : > { %1107 = vmatpush3.bf16.msra.mxu0 %v1251_v1  ;;  %1127 = vmatpush3.bf16.msra.mxu1 %v1259_v4  ;;  %v1256_v9 = vld [vmem:[%s1791_s18 + $0x28] sm:$0xff]   ;;  %v1262_v10 = vld [vmem:[%s1797_s8 + $0x18] sm:$0xff]   ;;  %v1257_v11 = vld [vmem:[%s1791_s18 + $0x30] sm:$0xff]   ;;  %s825_s22 = scalar_lea.sflag [#allocation4], %s1777_s15  ;;  %p1975_p10 = scmp.ne.s32.totalorder %s1961_s14, 0 }
  0xa0   : > { %1108 = vmatprep.subr.bf16.mxu0 %v1495_v0  ;;  %1128 = vmatprep.subr.bf16.mxu1 %v1495_v0  ;;  %v1263_v12 = vld [vmem:[%s1797_s8 + $0x20] sm:$0xff]   ;;  %v1258_v13 = vld [vmem:[%s1791_s18 + $0x38] sm:$0xff]   ;;  %v1264_v16 = vld [vmem:[%s1797_s8 + $0x28] sm:$0xff]   ;;  %s468_s9 = scalar_lea.vmem %s1936_s2, %s1861_s30  ;;  %s471_s19 = scalar_lea.vmem %s1938_s4, %s1861_s30 }
  0xa1   : > { %v477_v14 = vld [vmem:[%s1783_s12] sm:$0xff]  ;;  %v478_v15 = vld [vmem:[%s1783_s12 + $0x8] sm:$0xff]  ;;  %s474_s11 = scalar_lea.vmem %s1940_s6, %s1861_s30  ;;  %s840_s12 = sshll.u32 %s464_s20, 4  ;;  %s1881_s12 = int_to_ptr.vmem [resolvable:$true] %s840_s12 }
  0xa2   : > { %v496_v17 = vpack.c.bf16 %v478_v15, %v477_v14  ;;  %v1265_v18 = vld [vmem:[%s1797_s8 + $0x30] sm:$0xff]   ;;  %v1266_v19 = vld [vmem:[%s1797_s8 + $0x38] sm:$0xff]   ;;  %v1267_v20 = vld [vmem:[%s1800_s0] sm:$0xff]   ;;  %s1974_s18 = sld [smem:[#allocation22_spill]]  ;;  %s1395_s27 = scalar_lea.vmem %s1881_s12, 256 }
  0xa3   : > { %1109 = vmatpush3.bf16.msra.mxu0 %v1252_v2  ;;  %1129 = vmatpush3.bf16.msra.mxu1 %v1260_v6  ;;  %v1268_v21 = vld [vmem:[%s1800_s0 + $0x8] sm:$0xff]   ;;  %v1269_v22 = vld [vmem:[%s1800_s0 + $0x10] sm:$0xff]   ;;  %v1270_v23 = vld [vmem:[%s1800_s0 + $0x18] sm:$0xff]   ;;  %p1396_p6 = scmp.ne.s32.totalorder %s1881_s12, %s1395_s27  ;;  %s1497_s23 = smov [#allocation10]  }
  0xa4   : > { %1110 = vmatprep.subr.bf16.mxu0 %v1495_v0  ;;  %1130 = vmatprep.subr.bf16.mxu1 %v1495_v0  ;;  %v1271_v24 = vld [vmem:[%s1800_s0 + $0x20] sm:$0xff]   ;;  %v1272_v25 = vld [vmem:[%s1800_s0 + $0x28] sm:$0xff]   ;;  %v1273_v36 = vld [vmem:[%s1800_s0 + $0x30] sm:$0xff]  }
  0xa5   : > { %v1042_v26 = vld [vmem:[%s468_s9] ss:$0 sm:$0xff]  ;;  %v1274_v37 = vld [vmem:[%s1800_s0 + $0x38] sm:$0xff]   ;;  %p1397_p12 = pnand %p1396_p6, %p1975_p10  ;;  %s1399_s0 = sshll.u32 %s1497_s23, 4  ;;  %s1400_s0 = int_to_ptr.vmem [resolvable:$false] %s1399_s0 }
  0xa6   : > { %v1051_v38 = vld [vmem:[%s471_s19] ss:$0 sm:$0xff]  ;;  %s1401_s30 = scalar_lea.vmem %s1400_s0, 512  ;;  %p1402_p7 = scmp.lt.s32.totalorder %s1881_s12, %s1400_s0 }
  0xa7   : > { %1111 = vmatpush3.bf16.msra.mxu0 %v1253_v3  ;;  %1131 = vmatpush3.bf16.msra.mxu1 %v1261_v8  ;;  %v1060_v48 = vld [vmem:[%s474_s11] ss:$0 sm:$0xff]  ;;  %p1398_p11 = pneg %p1397_p12  ;;  %p1403_p2 = scmp.lt.s32.totalorder %s1401_s30, %s1395_s27 }
  0xa8   : > { %1112 = vmatprep.subr.bf16.mxu0 %v1495_v0  ;;  %1132 = vmatprep.subr.bf16.mxu1 %v1495_v0  ;;  %s1886_s8 = scalar_lea.hbm %s1974_s18, %s1078_s17 }
  0xa9   : > { %p1404_p4 = por %p1403_p2, %p1402_p7 }
  0xab   : > { %1113 = vmatpush3.bf16.msra.mxu0 %v1254_v5  ;;  %1133 = vmatpush3.bf16.msra.mxu1 %v1262_v10  ;;  %p1405_p0 = pnand %p1404_p4, %p1398_p11 }
  0xac   : > { %1114 = vmatprep.subr.bf16.mxu0 %v1495_v0  ;;  %1134 = vmatprep.subr.bf16.mxu1 %v1495_v0 }
  0xaf   : > { %1115 = vmatpush3.bf16.msra.mxu0 %v1255_v7  ;;  %1135 = vmatpush3.bf16.msra.mxu1 %v1263_v12 }
  0xb0   : > { %1116 = vmatprep.subr.bf16.mxu0 %v1495_v0  ;;  %1136 = vmatprep.subr.bf16.mxu1 %v1495_v0 }
  0xb3   : > { %1117 = vmatpush3.bf16.msra.mxu0 %v1256_v9  ;;  %1137 = vmatpush3.bf16.msra.mxu1 %v1264_v16 }
  0xb4   : > { %1118 = vmatprep.subr.bf16.mxu0 %v1495_v0  ;;  %1138 = vmatprep.subr.bf16.mxu1 %v1495_v0 }
  0xb7   : > { %1119 = vmatpush3.bf16.msra.mxu0 %v1257_v11  ;;  %1139 = vmatpush3.bf16.msra.mxu1 %v1265_v18 }
  0xb8   : > { %1120 = vmatprep.subr.bf16.mxu0 %v1495_v0  ;;  %1140 = vmatprep.subr.bf16.mxu1 %v1495_v0 }
  0xbb   : > { %1121 = vmatpush3.bf16.msra.mxu0 %v1258_v13  ;;  %1141 = vmatpush3.bf16.msra.mxu1 %v1266_v19 }
  0xbc   : > { %1146 = vmatprep.subr.bf16.mxu0 %v1495_v0 }
  0xbe   : > { %1123 = vmatmul.mubr.bf16.vlgmr.msra.gmra.mrb[0].mxu0 %v496_v17 }
  0xbf   : > { %1162 = vmatprep.mubr.msk.bf16.mxu0 %vm1496_vm0, %v1495_v0  ;;  %1147 = vmatpush3.bf16.msra.mxu0 %v1267_v20 }
  0xc0   : > { %1148 = vmatprep.subr.bf16.mxu0 %v1495_v0 }
  0xc3   : > { %1149 = vmatpush3.bf16.msra.mxu0 %v1268_v21 }
  0xc4   : > { %1150 = vmatprep.subr.bf16.mxu0 %v1495_v0 }
  0xc7   : > { %1151 = vmatpush3.bf16.msra.mxu0 %v1269_v22 }
  0xc8   : > { %1152 = vmatprep.subr.bf16.mxu0 %v1495_v0 }
  0xcb   : > { %1153 = vmatpush3.bf16.msra.mxu0 %v1270_v23 }
  0xcc   : > { %1154 = vmatprep.subr.bf16.mxu0 %v1495_v0 }
  0xcf   : > { %1155 = vmatpush3.bf16.msra.mxu0 %v1271_v24 }
  0xd0   : > { %1156 = vmatprep.subr.bf16.mxu0 %v1495_v0 }
  0xd3   : > { %1157 = vmatpush3.bf16.msra.mxu0 %v1272_v25 }
  0xd4   : > { %1158 = vmatprep.subr.bf16.mxu0 %v1495_v0 }
  0xd7   : > { %1159 = vmatpush3.bf16.msra.mxu0 %v1273_v36 }
  0xd8   : > { %1160 = vmatprep.subr.bf16.mxu0 %v1495_v0 }
  0xdb   : > { %1161 = vmatpush3.bf16.msra.mxu0 %v1274_v37 }
 0x191   : > { %v585_v27 = vpop.f32.mrb[0].mxu0 }
 0x192   : > { %v586_v28 = vadd.f32 %v1042_v26, %v585_v27  ;;  %v1124_v29 = vpop.f32.mrb[1].mxu0 }
 0x193   : > { %v588_v30 = vpop.f32.mrb[2].mxu0 }
 0x194   : > { %v589_v31 = vadd.f32 %v1042_v26, %v588_v30  ;;  %v1125_v32 = vpop.f32.mrb[3].mxu0  ;;  %v592_v33 = vmax.f32 %v586_v28, 0.0 }
 0x196   : > { %v593_v34 = vmax.f32 %v589_v31, 0.0 }
 0x198   : > { %v611_v35 = vpack.c.bf16 %v593_v34, %v592_v33 }
 0x19a   : > { %1143 = vmatmul.mubr.bf16.vlgmr.msra.gmra.mrb[0].mxu1 %v611_v35 }
 0x26d   : > { %v700_v39 = vpop.f32.mrb[0].mxu1 }
 0x26e   : > { %v701_v40 = vadd.f32 %v1051_v38, %v700_v39  ;;  %v1144_v41 = vpop.f32.mrb[1].mxu1 }
 0x26f   : > { %v703_v42 = vpop.f32.mrb[2].mxu1 }
 0x270   : > { %v704_v43 = vadd.f32 %v1051_v38, %v703_v42  ;;  %v1145_v44 = vpop.f32.mrb[3].mxu1  ;;  %v707_v45 = vmax.f32 %v701_v40, 0.0 }
 0x272   : > { %v708_v46 = vmax.f32 %v704_v43, 0.0 }
 0x274   : > { %v726_v47 = vpack.c.bf16 %v708_v46, %v707_v45 }
 0x276   : > { %1163 = vmatmul.mubr.bf16.vlgmr.msra.gmra.mrb[4].mxu0 %v726_v47 }
 0x349   : > { %v815_v49 = vpop.f32.mrb[4].mxu0 }
 0x34a   : > { %v816_v50 = vadd.f32 %v1060_v48, %v815_v49  ;;  %v1164_v51 = vpop.f32.mrb[5].mxu0 }
 0x34b   : > { %v818_v52 = vpop.f32.mrb[6].mxu0 }
 0x34c   : > { %822 = vst [vmem:[%s464_s20] sm:$0xff] %v816_v50  ;;  %v819_v53 = vadd.f32 %v1060_v48, %v818_v52  ;;  %v1165_v54 = vpop.f32.mrb[7].mxu0 }
 0x34e   : > { %823 = vst [vmem:[%s464_s20 + $0x8] sm:$0xff] %v819_v53 }
 0x34f   : > { %1408 = shalt.err (!%p1405_p0)
}
 0x350   : > { %s1409_s13 = scalar_lea.hbm %s1886_s8, 256  ;;  %s1413_s21 = scalar_lea.hbm %s1974_s18, 768 }
 0x351   : > { %p1410_p5 = scmp.ne.s32.totalorder %s1886_s8, %s1409_s13  ;;  %p1414_p1 = scmp.lt.u32.totalorder %s1886_s8, %s1974_s18 }
 0x352   : > { %p1415_p8 = scmp.lt.u32.totalorder %s1413_s21, %s1409_s13  ;;  %p1417_p6 = scmp.lt.u32.totalorder %s1409_s13, %s1886_s8 }
 0x353   : > { %p1411_p9 = pnand %p1410_p5, %p1975_p10 }
 0x354   : > { %p1416_p13 = por %p1415_p8, %p1414_p1 }
 0x355   : > { %p1412_p3 = pneg %p1411_p9 }
 0x356   : > { %p1418_p12 = por %p1417_p6, %p1416_p13 }
 0x358   : > { %p1419_p11 = pnand %p1418_p12, %p1412_p3 }
 0x35a   : > { %1422 = shalt.err (!%p1419_p11)
}
 0x35b   : > { %s1498_s1 = smov 128   ;;  %s1499_s7 = smov 8  }
 0x35c   : > { %1174 = dma.vmem_to_hbm [thread:$0]  (%p1975_p10), %s1881_s12, 256, %s1886_s8, %s825_s22, %s1498_s1, %s1498_s1, %s1499_s7  }
 0x35d PF: > { %s1976_s11 = sld [smem:[#allocation15_spill]]  ;;  %s1977_s20 = sld [smem:[#allocation19_spill]] }
 0x35e   : > { %p1194_p7 = scmp.ge.s32.totalorder %s1485_s29, 2 }
 0x363   : > { %s855_s17 = sand.u32 1, %s1976_s11   ;;  %p1978_p2 = scmp.ne.s32.totalorder %s1977_s20, 0 }
 0x364   : > { %s856_s10 = scalar_lea.sflag [#allocation4], %s855_s17 }
 0x365   : > { %p1190_p4 = pnand %p1194_p7, %p1978_p2 }
 0x367   : > { %1460 = dma.done.wait (!%p1190_p4), %s856_s10, 256  }
 0x368   : > { %1462 = vsyncadd (!%p1190_p4), %s856_s10, 4294967040  ;;  %s29_s29 = sadd.s32 1, %s1485_s29   ;;  %s1979_s27 = sld [smem:[#allocation16_spill]] }
 0x369   : > { %p26_p0 = scmp.ge.s32.totalorder %s29_s29, 5   ;;  %s1980_s26 = sld [smem:[#allocation18_spill]] }
 0x36a   : > { %s1981_s14 = sld [smem:[#allocation17_spill]]  ;;  %s1982_s24 = smov %s1469_s25 }
 0x36b   :  { %28 = sbr.rel (!%p26_p0) target bundleno = 14 (0xe), region = 139 }
 0x36e   : > { %s1983_s25 = smov %s1979_s27  ;;  %s1984_s27 = smov %s1481_s28 }
 0x370   : > { %s1985_s28 = smov %s1981_s14 }
 0x372   :  { %861 = vsyncpa [#allocation3], 1 }
 0x373   :  { %863 = vsyncpa [#allocation3 + $0x1], 1 }
 0x374   :  { %864 = vsyncpa [#allocation6], 1 }
 0x375   :  { %866 = vsyncpa [#allocation6 + $0x1], 1 }
 0x376   :  { %867 = vsyncpa [#allocation9], 1 }
 0x377   :  { %869 = vsyncpa [#allocation9 + $0x1], 1 }
 0x378   :  { %870 = vsyncpa [#allocation4], 1 }
 0x379   :  { %872 = vsyncpa [#allocation4 + $0x1], 1 }

// kernel: tpu_custom_call.1
= control target key start
LH: loop header
LB: loop body
LE: loop exit
PB: predicated region body
PF: predicated region fallthrough
CT: control target
= control target key end

     0   :  { %s1808_s0 = inlined_call_operand.hbm [shape: f32[3,16,128], index: 0, kind: input, shape index: {}]   ;;  %s1809_s1 = inlined_call_operand.hbm [shape: bf16[3,128,128], index: 1, kind: input, shape index: {}]   ;;  %s1810_s2 = inlined_call_operand.vmem [shape: f32[3,1,128], index: 2, kind: input, shape index: {}]   ;;  %s1811_s3 = inlined_call_operand.hbm [shape: bf16[3,128,128], index: 3, kind: input, shape index: {}]   ;;  %s1812_s4 = inlined_call_operand.vmem [shape: f32[3,1,128], index: 4, kind: input, shape index: {}]   ;;  %s1813_s5 = inlined_call_operand.hbm [shape: bf16[3,128,128], index: 5, kind: input, shape index: {}]   ;;  %s1814_s6 = inlined_call_operand.vmem [shape: f32[3,1,128], index: 6, kind: input, shape index: {}]   ;;  %s1815_s7 = inlined_call_operand.hbm [shape: f32[3,16,128], index: 7, kind: output, shape index: {}]  }
   0x1   :  { %1822 = sst [smem:[#allocation16_spill]] %s1809_s1 }
   0x2   :  { %12 = vsyncpa [#allocation3], 0 }
   0x3   :  { %14 = vsyncpa [#allocation3 + $0x1], 0 }
   0x4   :  { %15 = vsyncpa [#allocation6], 0 }
   0x5   :  { %16 = vsyncpa [#allocation9], 0 }
   0x6   :  { %17 = vsyncpa [#allocation4], 0 }
   0x7   :  { %19 = vsyncpa [#allocation4 + $0x1], 0  ;;  %s1467_s24 = smov 0   ;;  %s1469_s25 = smov 0  }
   0x8   :  { %s1471_s26 = smov 0   ;;  %s1473_s27 = smov 0  }
   0x9   :  { %s1475_s28 = smov 0   ;;  %s1477_s29 = smov 0  }
   0xa LB: > { %s949_s30 = sadd.s32 4294967295, %s1412_s29   ;;  %s950_s8 = sadd.s32 4294967294, %s1412_s29   ;;  %s1412_s29 = sphi %s1477_s29, %s25_s29   ;;  %s1408_s28 = sphi %s1475_s28, %s1845_s28   ;;  %s1404_s27 = sphi %s1473_s27, %s1844_s27   ;;  %s1400_s26 = sphi %s1471_s26, %s1843_s26   ;;  %s1396_s25 = sphi %s1469_s25, %s1842_s25   ;;  %s1392_s24 = sphi %s1467_s24, %s1841_s24  }
   0xb   : > { %p59_p0 = scmp.ne.s32.totalorder %s1396_s25, %s1392_s24  ;;  %p60_p1 = scmp.eq.s32.totalorder %s949_s30, 0 }
   0xc   : > { %p1501_p2 = scmp.eq.s32.totalorder %s949_s30, 2  ;;  %p247_p3 = scmp.eq.s32.totalorder %s950_s8, 2 }
   0xd   : > { %p1505_p4 = por %p60_p1, %p59_p0  ;;  %p951_p5 = scmp.ge.s32.totalorder %s1412_s29, 1 }
   0xe   : > { %s1823_s9 = scalar_select %p1501_p2, 1, 0 }
   0xf   : > { %s1824_s10 = scalar_select %p1505_p4, 1, 0 }
  0x10   : > { %p1510_p6 = por %p247_p3, %p59_p0  ;;  %p254_p7 = scmp.lt.s32.totalorder %s1412_s29, 4 }
  0x11   : > { %s997_s12 = sshll.u32 %s1404_s27, 10  ;;  %s1828_s1 = sld [smem:[#allocation16_spill]] }
  0x12   : > { %s1825_s11 = scalar_select %p1510_p6, 1, 0 }
  0x13   : > { %p1516_p8 = pnand %p951_p5, %p254_p7  ;;  %s1414_s17 = smov [#allocation5]  }
  0x14   : > { %1826 = sst [smem:[#allocation15_spill]] %s1825_s11  ;;  %s269_s18 = sshll.u32 %s1414_s17, 4  ;;  %s1527_s18 = int_to_ptr.vmem [resolvable:$true] %s269_s18 }
  0x15   : > { %s1827_s13 = scalar_select %p1516_p8, 1, 0 }
  0x16   : > { %p1099_p9 = pneg %p1516_p8  ;;  %s1538_s22 = scalar_lea.hbm %s1811_s3, %s997_s12 }
  0x17   : > { %s1523_s16 = scalar_lea.hbm %s1828_s1, %s997_s12  ;;  %s1543_s8 = scalar_lea.hbm %s1813_s5, %s997_s12 }
  0x18   : > { %p1531_p10 = pnand %p1099_p9, %p1505_p4  ;;  %s1415_s14 = smov [#allocation7]  }
  0x19   : > { %s1545_s15 = sshll.u32 %s1415_s14, 4  ;;  %s1202_s17 = scalar_lea.hbm %s1523_s16, 1024  ;;  %s292_s15 = int_to_ptr.vmem [resolvable:$true] %s1545_s15 }
  0x1a   : > { %s1829_s19 = scalar_select %p1531_p10, 1, 0 }
  0x1b   : > { %p1203_p11 = scmp.ne.s32.totalorder %s1523_s16, %s1202_s17  ;;  %p1551_p12 = pneg %p1531_p10 }
  0x1c   : > { %s1207_s23 = scalar_lea.hbm %s1828_s1, 3072  ;;  %p1208_p1 = scmp.lt.u32.totalorder %s1523_s16, %s1828_s1 }
  0x1d   : > { %p1205_p13 = pnand %p1551_p12, %p1203_p11  ;;  %p1209_p3 = scmp.lt.u32.totalorder %s1207_s23, %s1202_s17 }
  0x1e   : > { %p1211_p7 = scmp.lt.u32.totalorder %s1202_s17, %s1523_s16 }
  0x1f   : > { %p1206_p0 = pneg %p1205_p13  ;;  %p1210_p5 = por %p1209_p3, %p1208_p1 }
  0x21   : > { %p1212_p9 = por %p1211_p7, %p1210_p5 }
  0x23   : > { %p1213_p6 = pnand %p1212_p9, %p1206_p0 }
  0x25   : > { %1216 = shalt.err (!%p1213_p6)
}
  0x26   : > { %s1217_s14 = scalar_lea.vmem %s1527_s18, 1024  ;;  %p1225_p8 = scmp.lt.s32.totalorder %s1527_s18, %s1527_s18 }
  0x27   : > { %p1218_p11 = scmp.ne.s32.totalorder %s1527_s18, %s1217_s14  ;;  %p1226_p2 = scmp.lt.s32.totalorder %s1217_s14, %s1217_s14 }
  0x29   : > { %p1220_p13 = pnand %p1218_p11, %p1551_p12  ;;  %p1227_p10 = por %p1226_p2, %p1225_p8 }
  0x2b   : > { %p1221_p4 = pneg %p1220_p13 }
  0x2d   : > { %p1228_p1 = pnand %p1227_p10, %p1221_p4 }
  0x2f   : > { %1231 = shalt.err (!%p1228_p1)
}
  0x30   : > { %s1416_s20 = smov 64   ;;  %s1417_s17 = smov 4  }
  0x31   : > { %p1831_p6 = scmp.ne.s32.totalorder %s1829_s19, 0  ;;  %s1232_s21 = scalar_lea.hbm %s1538_s22, 1024 }
  0x32   : > { %p1233_p2 = scmp.ne.s32.totalorder %s1538_s22, %s1232_s21  ;;  %s1237_s30 = scalar_lea.hbm %s1811_s3, 3072 }
  0x33   : > { %1102 = dma.hbm_to_vmem [thread:$0]  (!%p1831_p6), %s1523_s16, 1024, %s1527_s18, [#allocation6], %s1416_s20, %s1416_s20, %s1417_s17  }
  0x34   : > { %p1235_p4 = pnand %p1233_p2, %p1551_p12  ;;  %p1238_p10 = scmp.lt.u32.totalorder %s1538_s22, %s1811_s3 }
  0x35   : > { %p1239_p0 = scmp.lt.u32.totalorder %s1237_s30, %s1232_s21  ;;  %p1241_p5 = scmp.lt.u32.totalorder %s1232_s21, %s1538_s22 }
  0x36   : > { %p1236_p8 = pneg %p1235_p4 }
  0x37   : > { %p1240_p3 = por %p1239_p0, %p1238_p10 }
  0x39   : > { %p1242_p7 = por %p1241_p5, %p1240_p3 }
  0x3b   : > { %p1243_p9 = pnand %p1242_p7, %p1236_p8 }
  0x3d   : > { %1246 = shalt.err (!%p1243_p9)
}
  0x3e   : > { %s1247_s16 = scalar_lea.vmem %s292_s15, 1024  ;;  %p1255_p2 = scmp.lt.s32.totalorder %s292_s15, %s292_s15 }
  0x3f   : > { %p1248_p11 = scmp.ne.s32.totalorder %s292_s15, %s1247_s16  ;;  %p1256_p4 = scmp.lt.s32.totalorder %s1247_s16, %s1247_s16 }
  0x41   : > { %p1250_p13 = pnand %p1248_p11, %p1551_p12  ;;  %p1257_p6 = por %p1256_p4, %p1255_p2 }
  0x43   : > { %p1251_p1 = pneg %p1250_p13 }
  0x45   : > { %p1258_p0 = pnand %p1257_p6, %p1251_p1 }
  0x47   : > { %1261 = shalt.err (!%p1258_p0)
}
  0x48   : > { %p1832_p10 = scmp.ne.s32.totalorder %s1829_s19, 0  ;;  %s1418_s1 = smov [#allocation8]  }
  0x49   : > { %s313_s18 = sshll.u32 %s1418_s1, 4  ;;  %s1262_s21 = scalar_lea.hbm %s1543_s8, 1024  ;;  %s314_s18 = int_to_ptr.vmem [resolvable:$true] %s313_s18 }
  0x4a   : > { %1105 = dma.hbm_to_vmem [thread:$0]  (!%p1832_p10), %s1538_s22, 1024, %s292_s15, [#allocation6], %s1416_s20, %s1416_s20, %s1417_s17  }
  0x4b   : > { %p1263_p8 = scmp.ne.s32.totalorder %s1543_s8, %s1262_s21  ;;  %s1267_s30 = scalar_lea.hbm %s1813_s5, 3072 }
  0x4c   : > { %p1268_p5 = scmp.lt.u32.totalorder %s1543_s8, %s1813_s5  ;;  %p1269_p7 = scmp.lt.u32.totalorder %s1267_s30, %s1262_s21 }
  0x4d   : > { %p1265_p6 = pnand %p1263_p8, %p1551_p12  ;;  %p1271_p11 = scmp.lt.u32.totalorder %s1262_s21, %s1543_s8 }
  0x4e   : > { %p1270_p9 = por %p1269_p7, %p1268_p5 }
  0x4f   : > { %p1266_p3 = pneg %p1265_p6 }
  0x50   : > { %p1272_p13 = por %p1271_p11, %p1270_p9 }
  0x52   : > { %p1273_p1 = pnand %p1272_p13, %p1266_p3 }
  0x54   : > { %1276 = shalt.err (!%p1273_p1)
}
  0x55   : > { %s1277_s22 = scalar_lea.vmem %s314_s18, 1024  ;;  %p1285_p8 = scmp.lt.s32.totalorder %s314_s18, %s314_s18 }
  0x56   : > { %p1278_p2 = scmp.ne.s32.totalorder %s314_s18, %s1277_s22  ;;  %p1286_p6 = scmp.lt.s32.totalorder %s1277_s22, %s1277_s22 }
  0x58   : > { %p1280_p4 = pnand %p1278_p2, %p1551_p12  ;;  %p1287_p10 = por %p1286_p6, %p1285_p8 }
  0x5a   : > { %p1281_p0 = pneg %p1280_p4 }
  0x5c   : > { %p1288_p5 = pnand %p1287_p10, %p1281_p0 }
  0x5e   : > { %1291 = shalt.err (!%p1288_p5)
}
  0x5f   : > { %p1833_p7 = scmp.ne.s32.totalorder %s1829_s19, 0  ;;  %s37_s11 = sadd.s32 1, %s1408_s28 }
  0x60   : > { %s46_s15 = sadd.s32 1, %s1400_s26  ;;  %p39_p12 = scmp.ge.s32.totalorder %s37_s11, 3 }
  0x61   : > { %1108 = dma.hbm_to_vmem [thread:$0]  (!%p1833_p7), %s1543_s8, 1024, %s314_s18, [#allocation9], %s1416_s20, %s1416_s20, %s1417_s17  }
  0x62   : > { %p53_p10 = scmp.ne.s32.totalorder %s1400_s26, %s1396_s25  ;;  %p54_p3 = scmp.eq.s32.totalorder %s1412_s29, 0 }
  0x63   : > { %p1117_p9 = scmp.lt.s32.totalorder %s1412_s29, 3  ;;  %s1847_s11 = smov (%p39_p12, %s37_s11), 0 }
  0x64   : > { %p55_p11 = por %p54_p3, %p53_p10  ;;  %p1834_p13 = scmp.ne.s32.totalorder %s1823_s9, 0 }
  0x65   : > { %s41_s1 = ssub.s32 %s1408_s28, %s1847_s11  ;;  %s333_s21 = sand.u32 1, %s1400_s26  }
  0x66   : > { %p1629_p1 = por %p1834_p13, %p53_p10  ;;  %p44_p2 = scmp.eq.s32.totalorder %s41_s1, 0 }
  0x67   : > { %s959_s8 = sshll.u32 %s333_s21, 4  ;;  %s1000_s20 = sshll.u32 %s1408_s28, 8 }
  0x68   : > { %s1638_s17 = scalar_select %p44_p2, %s1400_s26, %s46_s15  }
  0x69   : > { %s1643_s12 = scalar_lea.hbm %s1808_s0, %s1000_s20  ;;  %s337_s9 = scalar_lea.vmem [#allocation2], %s959_s8 }
  0x6a   : > { %s346_s30 = sshll.u32 %s337_s9, 4  ;;  %p1647_p4 = pnand %p1117_p9, %p55_p11  ;;  %s1651_s30 = int_to_ptr.vmem [resolvable:$true] %s346_s30 }
  0x6b   : > { %s1653_s16 = scalar_lea.sflag [#allocation3], %s333_s21  ;;  %s1292_s22 = scalar_lea.hbm %s1643_s12, 256 }
  0x6c   : > { %p1293_p0 = scmp.ne.s32.totalorder %s1643_s12, %s1292_s22  ;;  %p1294_p8 = pneg %p1647_p4 }
  0x6d   : > { %s1297_s8 = scalar_lea.hbm %s1808_s0, 768  ;;  %p1298_p7 = scmp.lt.u32.totalorder %s1643_s12, %s1808_s0 }
  0x6e   : > { %p1295_p6 = pnand %p1294_p8, %p1293_p0  ;;  %p1299_p12 = scmp.lt.u32.totalorder %s1297_s8, %s1292_s22 }
  0x6f   : > { %p1301_p3 = scmp.lt.u32.totalorder %s1292_s22, %s1643_s12 }
  0x70   : > { %p1296_p5 = pneg %p1295_p6  ;;  %p1300_p10 = por %p1299_p12, %p1298_p7 }
  0x72   : > { %p1302_p9 = por %p1301_p3, %p1300_p10 }
  0x74   : > { %p1303_p11 = pnand %p1302_p9, %p1296_p5 }
  0x76   : > { %1306 = shalt.err (!%p1303_p11)
}
  0x77   : > { %s1307_s21 = scalar_lea.vmem %s1651_s30, 256  ;;  %s1419_s23 = smov [#allocation2]  }
  0x78   : > { %p1308_p13 = scmp.ne.s32.totalorder %s1651_s30, %s1307_s21  ;;  %s1312_s9 = sshll.u32 %s1419_s23, 4  ;;  %s1313_s9 = int_to_ptr.vmem [resolvable:$false] %s1312_s9 }
  0x79   : > { %s1314_s15 = scalar_lea.vmem %s1313_s9, 512  ;;  %p1315_p6 = scmp.lt.s32.totalorder %s1651_s30, %s1313_s9 }
  0x7a   : > { %p1310_p2 = pnand %p1308_p13, %p1294_p8  ;;  %p1316_p7 = scmp.lt.s32.totalorder %s1314_s15, %s1307_s21 }
  0x7c   : > { %p1311_p0 = pneg %p1310_p2  ;;  %p1317_p12 = por %p1316_p7, %p1315_p6 }
  0x7e   : > { %p1318_p10 = pnand %p1317_p12, %p1311_p0 }
  0x80   : > { %1321 = shalt.err (!%p1318_p10)
}
  0x81   : > { %s1420_s22 = smov 128   ;;  %s1421_s1 = smov 8  }
  0x82   : > { %1112 = dma.hbm_to_vmem [thread:$0]  (!%p1647_p4), %s1643_s12, 256, %s1651_s30, %s1653_s16, %s1420_s22, %s1420_s22, %s1421_s1  }
  0x83   : > { %p1837_p8 = scmp.ne.s32.totalorder %s1827_s13, 0 }
  0x84   : > { %s1684_s8 = sand.u32 (!%p1837_p8), 1, %s1396_s25   ;;  %p1838_p5 = scmp.ne.s32.totalorder (!%p1837_p8), %s1824_s10, 0 }
  0x85   : > { %358 = sbr.rel (%p1837_p8) target bundleno = 850 (0x352), region = 48  ;;  %s963_s20 = sshll.u32 (!%p1837_p8), %s1684_s8, 4 }
  0x86   : > { %s361_s18 = scalar_lea.sflag (!%p1837_p8), [#allocation3], %s1684_s8  ;;  %s1690_s21 = scalar_lea.vmem (!%p1837_p8), [#allocation2], %s963_s20 }
  0x8c   : > { %1375 = dma.done.wait (%p1838_p5), %s361_s18, 256  }
  0x8d   : > { %1377 = vsyncadd (%p1838_p5), %s361_s18, 4294967040 }
  0x8e   : > { %1379 = dma.done.wait (%p1838_p5), [#allocation6], 2048  }
  0x8f   : > { %1381 = vsyncadd (%p1838_p5), [#allocation6], 4294965248 }
  0x90   : > { %1383 = dma.done.wait (%p1838_p5), [#allocation9], 1024  }
  0x91   : > { %1385 = vsyncadd (%p1838_p5), [#allocation9], 4294966272  ;;  %v1422_v0 = vmov 0.0   ;;  %vm1423_vm0 = vmmov 0   ;;  %v1178_v1 = vld [vmem:[#allocation5] sm:$0xff]   ;;  %v1179_v2 = vld [vmem:[#allocation5 + $0x8] sm:$0xff]  }
  0x92   : > { %1029 = vmatprep.subr.bf16.mxu0 %v1422_v0  ;;  %1045 = vmatprep.mubr.msk.bf16.mxu0 %vm1423_vm0, %v1422_v0  ;;  %v1180_v3 = vld [vmem:[#allocation5 + $0x10] sm:$0xff]   ;;  %v1186_v4 = vld [vmem:[#allocation7] sm:$0xff]   ;;  %v1181_v5 = vld [vmem:[#allocation5 + $0x18] sm:$0xff]   ;;  %p417_p4 = scmp.lt.s32.totalorder %s1404_s27, 2  ;;  %s415_s1 = scalar_lea.vmem [#allocation10], %s963_s20 }
  0x93   : > { %1049 = vmatprep.subr.bf16.mxu1 %v1422_v0  ;;  %1065 = vmatprep.mubr.msk.bf16.mxu1 %vm1423_vm0, %v1422_v0  ;;  %v1187_v6 = vld [vmem:[#allocation7 + $0x8] sm:$0xff]   ;;  %v1182_v7 = vld [vmem:[#allocation5 + $0x20] sm:$0xff]   ;;  %v1188_v8 = vld [vmem:[#allocation7 + $0x10] sm:$0xff]   ;;  %s791_s18 = sshll.u32 %s415_s1, 4  ;;  %s776_s20 = scalar_lea.sflag [#allocation4], %s1684_s8  ;;  %s1755_s18 = int_to_ptr.vmem [resolvable:$true] %s791_s18 }
  0x94   : > { %1030 = vmatpush3.bf16.msra.mxu0 %v1178_v1  ;;  %1050 = vmatpush3.bf16.msra.mxu1 %v1186_v4  ;;  %v1183_v9 = vld [vmem:[#allocation5 + $0x28] sm:$0xff]   ;;  %v1189_v10 = vld [vmem:[#allocation7 + $0x18] sm:$0xff]   ;;  %v1184_v11 = vld [vmem:[#allocation5 + $0x30] sm:$0xff]   ;;  %s1737_s10 = scalar_select %p417_p4, %s1404_s27, 2 }
  0x95   : > { %1031 = vmatprep.subr.bf16.mxu0 %v1422_v0  ;;  %1051 = vmatprep.subr.bf16.mxu1 %v1422_v0  ;;  %v1190_v12 = vld [vmem:[#allocation7 + $0x20] sm:$0xff]   ;;  %v1185_v13 = vld [vmem:[#allocation5 + $0x38] sm:$0xff]   ;;  %v1191_v16 = vld [vmem:[#allocation7 + $0x28] sm:$0xff]  }
  0x96   : > { %v428_v14 = vld [vmem:[%s1690_s21] sm:$0xff]  ;;  %v429_v15 = vld [vmem:[%s1690_s21 + $0x8] sm:$0xff]  ;;  %s419_s30 = scalar_lea.vmem %s1810_s2, %s1737_s10  ;;  %s422_s23 = scalar_lea.vmem %s1812_s4, %s1737_s10 }
  0x97   : > { %v447_v17 = vpack.c.bf16 %v429_v15, %v428_v14  ;;  %v1192_v18 = vld [vmem:[#allocation7 + $0x30] sm:$0xff]   ;;  %v1193_v19 = vld [vmem:[#allocation7 + $0x38] sm:$0xff]   ;;  %v1194_v20 = vld [vmem:[#allocation8] sm:$0xff]   ;;  %s425_s22 = scalar_lea.vmem %s1814_s6, %s1737_s10  ;;  %s1001_s21 = sshll.u32 %s1404_s27, 8 }
  0x98   : > { %1032 = vmatpush3.bf16.msra.mxu0 %v1179_v2  ;;  %1052 = vmatpush3.bf16.msra.mxu1 %v1187_v6  ;;  %v1195_v21 = vld [vmem:[#allocation8 + $0x8] sm:$0xff]   ;;  %v1196_v22 = vld [vmem:[#allocation8 + $0x10] sm:$0xff]   ;;  %v1197_v23 = vld [vmem:[#allocation8 + $0x18] sm:$0xff]   ;;  %s1322_s27 = scalar_lea.vmem %s1755_s18, 256  ;;  %s1424_s10 = smov [#allocation10]  }
  0x99   : > { %1033 = vmatprep.subr.bf16.mxu0 %v1422_v0  ;;  %1053 = vmatprep.subr.bf16.mxu1 %v1422_v0  ;;  %v1198_v24 = vld [vmem:[#allocation8 + $0x20] sm:$0xff]   ;;  %v1199_v25 = vld [vmem:[#allocation8 + $0x28] sm:$0xff]   ;;  %v1200_v36 = vld [vmem:[#allocation8 + $0x30] sm:$0xff]   ;;  %p1323_p3 = scmp.ne.s32.totalorder %s1755_s18, %s1322_s27  ;;  %s1326_s14 = sshll.u32 %s1424_s10, 4  ;;  %s1327_s14 = int_to_ptr.vmem [resolvable:$false] %s1326_s14 }
  0x9a   : > { %v965_v26 = vld [vmem:[%s419_s30] ss:$0 sm:$0xff]  ;;  %v1201_v37 = vld [vmem:[#allocation8 + $0x38] sm:$0xff]   ;;  %s1760_s30 = scalar_lea.hbm %s1815_s7, %s1001_s21  ;;  %s1328_s16 = scalar_lea.vmem %s1327_s14, 512 }
  0x9b   : > { %v974_v38 = vld [vmem:[%s422_s23] ss:$0 sm:$0xff]  ;;  %p1324_p9 = pnand %p1323_p3, %p1629_p1  ;;  %p1329_p13 = scmp.lt.s32.totalorder %s1755_s18, %s1327_s14 }
  0x9c   : > { %1034 = vmatpush3.bf16.msra.mxu0 %v1180_v3  ;;  %1054 = vmatpush3.bf16.msra.mxu1 %v1188_v8  ;;  %v983_v48 = vld [vmem:[%s425_s22] ss:$0 sm:$0xff]  ;;  %p1330_p2 = scmp.lt.s32.totalorder %s1328_s16, %s1322_s27 }
  0x9d   : > { %1035 = vmatprep.subr.bf16.mxu0 %v1422_v0  ;;  %1055 = vmatprep.subr.bf16.mxu1 %v1422_v0  ;;  %p1325_p11 = pneg %p1324_p9 }
  0x9e   : > { %p1331_p0 = por %p1330_p2, %p1329_p13 }
  0xa0   : > { %1036 = vmatpush3.bf16.msra.mxu0 %v1181_v5  ;;  %1056 = vmatpush3.bf16.msra.mxu1 %v1189_v10  ;;  %p1332_p6 = pnand %p1331_p0, %p1325_p11 }
  0xa1   : > { %1037 = vmatprep.subr.bf16.mxu0 %v1422_v0  ;;  %1057 = vmatprep.subr.bf16.mxu1 %v1422_v0 }
  0xa4   : > { %1038 = vmatpush3.bf16.msra.mxu0 %v1182_v7  ;;  %1058 = vmatpush3.bf16.msra.mxu1 %v1190_v12 }
  0xa5   : > { %1039 = vmatprep.subr.bf16.mxu0 %v1422_v0  ;;  %1059 = vmatprep.subr.bf16.mxu1 %v1422_v0 }
  0xa8   : > { %1040 = vmatpush3.bf16.msra.mxu0 %v1183_v9  ;;  %1060 = vmatpush3.bf16.msra.mxu1 %v1191_v16 }
  0xa9   : > { %1041 = vmatprep.subr.bf16.mxu0 %v1422_v0  ;;  %1061 = vmatprep.subr.bf16.mxu1 %v1422_v0 }
  0xac   : > { %1042 = vmatpush3.bf16.msra.mxu0 %v1184_v11  ;;  %1062 = vmatpush3.bf16.msra.mxu1 %v1192_v18 }
  0xad   : > { %1043 = vmatprep.subr.bf16.mxu0 %v1422_v0  ;;  %1063 = vmatprep.subr.bf16.mxu1 %v1422_v0 }
  0xb0   : > { %1044 = vmatpush3.bf16.msra.mxu0 %v1185_v13  ;;  %1064 = vmatpush3.bf16.msra.mxu1 %v1193_v19 }
  0xb1   : > { %1069 = vmatprep.subr.bf16.mxu0 %v1422_v0 }
  0xb3   : > { %1046 = vmatmul.mubr.bf16.vlgmr.msra.gmra.mrb[0].mxu0 %v447_v17 }
  0xb4   : > { %1085 = vmatprep.mubr.msk.bf16.mxu0 %vm1423_vm0, %v1422_v0  ;;  %1070 = vmatpush3.bf16.msra.mxu0 %v1194_v20 }
  0xb5   : > { %1071 = vmatprep.subr.bf16.mxu0 %v1422_v0 }
  0xb8   : > { %1072 = vmatpush3.bf16.msra.mxu0 %v1195_v21 }
  0xb9   : > { %1073 = vmatprep.subr.bf16.mxu0 %v1422_v0 }
  0xbc   : > { %1074 = vmatpush3.bf16.msra.mxu0 %v1196_v22 }
  0xbd   : > { %1075 = vmatprep.subr.bf16.mxu0 %v1422_v0 }
  0xc0   : > { %1076 = vmatpush3.bf16.msra.mxu0 %v1197_v23 }
  0xc1   : > { %1077 = vmatprep.subr.bf16.mxu0 %v1422_v0 }
  0xc4   : > { %1078 = vmatpush3.bf16.msra.mxu0 %v1198_v24 }
  0xc5   : > { %1079 = vmatprep.subr.bf16.mxu0 %v1422_v0 }
  0xc8   : > { %1080 = vmatpush3.bf16.msra.mxu0 %v1199_v25 }
  0xc9   : > { %1081 = vmatprep.subr.bf16.mxu0 %v1422_v0 }
  0xcc   : > { %1082 = vmatpush3.bf16.msra.mxu0 %v1200_v36 }
  0xcd   : > { %1083 = vmatprep.subr.bf16.mxu0 %v1422_v0 }
  0xd0   : > { %1084 = vmatpush3.bf16.msra.mxu0 %v1201_v37 }
 0x186   : > { %v536_v27 = vpop.f32.mrb[0].mxu0 }
 0x187   : > { %v537_v28 = vadd.f32 %v965_v26, %v536_v27  ;;  %v1047_v29 = vpop.f32.mrb[1].mxu0 }
 0x188   : > { %v539_v30 = vpop.f32.mrb[2].mxu0 }
 0x189   : > { %v540_v31 = vadd.f32 %v965_v26, %v539_v30  ;;  %v1048_v32 = vpop.f32.mrb[3].mxu0  ;;  %v543_v33 = vmax.f32 %v537_v28, 0.0 }
 0x18b   : > { %v544_v34 = vmax.f32 %v540_v31, 0.0 }
 0x18d   : > { %v562_v35 = vpack.c.bf16 %v544_v34, %v543_v33 }
 0x18f   : > { %1066 = vmatmul.mubr.bf16.vlgmr.msra.gmra.mrb[0].mxu1 %v562_v35 }
 0x262   : > { %v651_v39 = vpop.f32.mrb[0].mxu1 }
 0x263   : > { %v652_v40 = vadd.f32 %v974_v38, %v651_v39  ;;  %v1067_v41 = vpop.f32.mrb[1].mxu1 }
 0x264   : > { %v654_v42 = vpop.f32.mrb[2].mxu1 }
 0x265   : > { %v655_v43 = vadd.f32 %v974_v38, %v654_v42  ;;  %v1068_v44 = vpop.f32.mrb[3].mxu1  ;;  %v658_v45 = vmax.f32 %v652_v40, 0.0 }
 0x267   : > { %v659_v46 = vmax.f32 %v655_v43, 0.0 }
 0x269   : > { %v677_v47 = vpack.c.bf16 %v659_v46, %v658_v45 }
 0x26b   : > { %1086 = vmatmul.mubr.bf16.vlgmr.msra.gmra.mrb[4].mxu0 %v677_v47 }
 0x33e   : > { %v766_v49 = vpop.f32.mrb[4].mxu0 }
 0x33f   : > { %v767_v50 = vadd.f32 %v983_v48, %v766_v49  ;;  %v1087_v51 = vpop.f32.mrb[5].mxu0 }
 0x340   : > { %v769_v52 = vpop.f32.mrb[6].mxu0 }
 0x341   : > { %773 = vst [vmem:[%s415_s1] sm:$0xff] %v767_v50  ;;  %v770_v53 = vadd.f32 %v983_v48, %v769_v52  ;;  %v1088_v54 = vpop.f32.mrb[7].mxu0 }
 0x343   : > { %774 = vst [vmem:[%s415_s1 + $0x8] sm:$0xff] %v770_v53 }
 0x344   : > { %1335 = shalt.err (!%p1332_p6)
}
 0x345   : > { %s1336_s23 = scalar_lea.hbm %s1760_s30, 256  ;;  %s1340_s22 = scalar_lea.hbm %s1815_s7, 768 }
 0x346   : > { %p1337_p7 = scmp.ne.s32.totalorder %s1760_s30, %s1336_s23  ;;  %p1341_p8 = scmp.lt.u32.totalorder %s1760_s30, %s1815_s7 }
 0x347   : > { %p1342_p5 = scmp.lt.u32.totalorder %s1340_s22, %s1336_s23  ;;  %p1344_p3 = scmp.lt.u32.totalorder %s1336_s23, %s1760_s30 }
 0x348   : > { %p1338_p12 = pnand %p1337_p7, %p1629_p1 }
 0x349   : > { %p1343_p4 = por %p1342_p5, %p1341_p8 }
 0x34a   : > { %p1339_p10 = pneg %p1338_p12 }
 0x34b   : > { %p1345_p9 = por %p1344_p3, %p1343_p4 }
 0x34d   : > { %p1346_p11 = pnand %p1345_p9, %p1339_p10 }
 0x34f   : > { %1349 = shalt.err (!%p1346_p11)
}
 0x350   : > { %s1425_s13 = smov 128   ;;  %s1426_s12 = smov 8  }
 0x351   : > { %1097 = dma.vmem_to_hbm [thread:$0]  (%p1629_p1), %s1755_s18, 256, %s1760_s30, %s776_s20, %s1425_s13, %s1425_s13, %s1426_s12  }
 0x352 PF: > { %s1839_s27 = sld [smem:[#allocation15_spill]]  ;;  %p1118_p13 = scmp.ge.s32.totalorder %s1412_s29, 2 }
 0x353   : > { %s806_s10 = sand.u32 1, %s1392_s24  }
 0x354   : > { %s807_s14 = scalar_lea.sflag [#allocation4], %s806_s10 }
 0x358   : > { %p1840_p2 = scmp.ne.s32.totalorder %s1839_s27, 0 }
 0x35a   : > { %p1114_p0 = pnand %p1118_p13, %p1840_p2 }
 0x35c   : > { %1387 = dma.done.wait (!%p1114_p0), %s807_s14, 256  }
 0x35d   : > { %1389 = vsyncadd (!%p1114_p0), %s807_s14, 4294967040  ;;  %s25_s29 = sadd.s32 1, %s1412_s29   ;;  %s1841_s24 = smov %s1396_s25 }
 0x35e   : > { %p22_p6 = scmp.ge.s32.totalorder %s25_s29, 5   ;;  %s1842_s25 = smov %s1400_s26 }
 0x35f   : > { %s1843_s26 = smov %s1638_s17  ;;  %s1844_s27 = smov %s1408_s28 }
 0x360   : > { %s1845_s28 = smov %s1847_s11  ;;  %24 = sbr.rel (!%p22_p6) target bundleno = 10 (0xa), region = 117 }
 0x367   :  { %812 = vsyncpa [#allocation3], 1 }
 0x368   :  { %814 = vsyncpa [#allocation3 + $0x1], 1 }
 0x369   :  { %815 = vsyncpa [#allocation6], 1 }
 0x36a   :  { %816 = vsyncpa [#allocation9], 1 }
 0x36b   :  { %817 = vsyncpa [#allocation4], 1 }
 0x36c   :  { %819 = vsyncpa [#allocation4 + $0x1], 1 }

// kernel: tpu_custom_call.1
= control target key start
LH: loop header
LB: loop body
LE: loop exit
PB: predicated region body
PF: predicated region fallthrough
CT: control target
= control target key end

     0   :  { %s1934_s0 = inlined_call_operand.hbm [shape: f32[3,16,128], index: 0, kind: input, shape index: {}]   ;;  %s1935_s1 = inlined_call_operand.hbm [shape: bf16[3,128,128], index: 1, kind: input, shape index: {}]   ;;  %s1936_s2 = inlined_call_operand.vmem [shape: f32[3,1,128], index: 2, kind: input, shape index: {}]   ;;  %s1937_s3 = inlined_call_operand.hbm [shape: bf16[3,128,128], index: 3, kind: input, shape index: {}]   ;;  %s1938_s4 = inlined_call_operand.vmem [shape: f32[3,1,128], index: 4, kind: input, shape index: {}]   ;;  %s1939_s5 = inlined_call_operand.hbm [shape: bf16[3,128,128], index: 5, kind: input, shape index: {}]   ;;  %s1940_s6 = inlined_call_operand.vmem [shape: f32[3,1,128], index: 6, kind: input, shape index: {}]   ;;  %s1941_s7 = inlined_call_operand.hbm [shape: f32[3,16,128], index: 7, kind: output, shape index: {}]  }
   0x1   :  { %1953 = sst [smem:[#allocation20_spill]] %s1934_s0 }
   0x2   :  { %1954 = sst [smem:[#allocation21_spill]] %s1935_s1 }
   0x3   :  { %1955 = sst [smem:[#allocation22_spill]] %s1941_s7 }
   0x4   :  { %12 = vsyncpa [#allocation3], 0 }
   0x5   :  { %14 = vsyncpa [#allocation3 + $0x1], 0 }
   0x6   :  { %15 = vsyncpa [#allocation6], 0 }
   0x7   :  { %17 = vsyncpa [#allocation6 + $0x1], 0 }
   0x8   :  { %18 = vsyncpa [#allocation9], 0 }
   0x9   :  { %20 = vsyncpa [#allocation9 + $0x1], 0 }
   0xa   :  { %21 = vsyncpa [#allocation4], 0 }
   0xb   :  { %23 = vsyncpa [#allocation4 + $0x1], 0  ;;  %s1540_s24 = smov 0   ;;  %s1542_s25 = smov 0  }
   0xc   :  { %s1544_s26 = smov 0   ;;  %s1546_s27 = smov 0  }
   0xd   :  { %s1548_s28 = smov 0   ;;  %s1550_s29 = smov 0  }
   0xe LB: > { %1956 = sst [smem:[#allocation15_spill]] %s1465_s24  ;;  %s1571_s30 = sadd.s32 4294967295, %s1485_s29   ;;  %s1485_s29 = sphi %s1550_s29, %s29_s29   ;;  %s1481_s28 = sphi %s1548_s28, %s1985_s28   ;;  %s1477_s27 = sphi %s1546_s27, %s1984_s27   ;;  %s1473_s26 = sphi %s1544_s26, %s1980_s26   ;;  %s1469_s25 = sphi %s1542_s25, %s1983_s25   ;;  %s1465_s24 = sphi %s1540_s24, %s1982_s24  }
   0xf   : > { %1957 = sst [smem:[#allocation16_spill]] %s1473_s26  ;;  %s1021_s8 = sadd.s32 4294967294, %s1485_s29  }
  0x10   : > { %s41_s9 = sadd.s32 1, %s1481_s28  ;;  %s50_s10 = sadd.s32 1, %s1473_s26 }
  0x11   : > { %p43_p0 = scmp.ge.s32.totalorder %s41_s9, 3  ;;  %p57_p1 = scmp.ne.s32.totalorder %s1473_s26, %s1469_s25 }
  0x12   : > { %p58_p2 = scmp.eq.s32.totalorder %s1485_s29, 0  ;;  %p63_p3 = scmp.ne.s32.totalorder %s1469_s25, %s1465_s24 }
  0x13   : > { %s1987_s9 = smov (%p43_p0, %s41_s9), 0  ;;  %p64_p5 = scmp.eq.s32.totalorder %s1571_s30, 0 }
  0x14   : > { %1958 = sst [smem:[#allocation17_spill]] %s1987_s9  ;;  %p1583_p4 = por %p58_p2, %p57_p1 }
  0x15   : > { %s45_s12 = ssub.s32 %s1481_s28, %s1987_s9  ;;  %p245_p6 = scmp.eq.s32.totalorder %s1571_s30, 2 }
  0x16   : > { %p48_p7 = scmp.eq.s32.totalorder %s45_s12, 0  ;;  %p1591_p8 = por %p64_p5, %p63_p3 }
  0x17   : > { %p1595_p9 = por %p245_p6, %p57_p1  ;;  %p251_p10 = scmp.eq.s32.totalorder %s1021_s8, 2 }
  0x18   : > { %s1960_s13 = scalar_select %p1591_p8, 1, 0 }
  0x19   : > { %s1961_s14 = scalar_select %p1595_p9, 1, 0 }
  0x1a   : > { %s1600_s15 = scalar_select %p48_p7, %s1473_s26, %s50_s10  }
  0x1b   : > { %p1602_p11 = por %p251_p10, %p63_p3  ;;  %p1193_p12 = scmp.lt.s32.totalorder %s1485_s29, 3 }
  0x1c   : > { %1962 = sst [smem:[#allocation18_spill]] %s1600_s15  ;;  %s1608_s17 = sand.u32 1, %s1473_s26  }
  0x1d   : > { %s1963_s16 = scalar_select %p1602_p11, 1, 0 }
  0x1e   : > { %s294_s18 = sand.u32 1, %s1485_s29   ;;  %s1612_s19 = sshll.u32 %s1608_s17, 6 }
  0x1f   : > { %1964 = sst [smem:[#allocation19_spill]] %s1963_s16  ;;  %p1616_p13 = pnand %p1193_p12, %p1583_p4 }
  0x20   : > { %s1621_s21 = sshll.u32 %s1481_s28, 10  ;;  %s1966_s1 = sld [smem:[#allocation21_spill]] }
  0x21   : > { %s298_s10 = scalar_lea.vmem [#allocation5], %s1612_s19  ;;  %s1632_s12 = scalar_lea.sflag [#allocation6], %s294_s18 }
  0x22   : > { %s305_s11 = sshll.u32 %s298_s10, 4  ;;  %p1638_p1 = pneg %p1616_p13  ;;  %s1630_s11 = int_to_ptr.vmem [resolvable:$true] %s305_s11 }
  0x26   : > { %s1627_s8 = scalar_lea.hbm %s1966_s1, %s1621_s21  ;;  %s1280_s26 = scalar_lea.hbm %s1966_s1, 3072 }
  0x27   : > { %s1275_s9 = scalar_lea.hbm %s1627_s8, 1024  ;;  %p1281_p4 = scmp.lt.u32.totalorder %s1627_s8, %s1966_s1 }
  0x28   : > { %p1276_p0 = scmp.ne.s32.totalorder %s1627_s8, %s1275_s9  ;;  %p1282_p5 = scmp.lt.u32.totalorder %s1280_s26, %s1275_s9 }
  0x29   : > { %p1284_p7 = scmp.lt.u32.totalorder %s1275_s9, %s1627_s8 }
  0x2a   : > { %p1278_p2 = pnand %p1638_p1, %p1276_p0  ;;  %p1283_p6 = por %p1282_p5, %p1281_p4 }
  0x2c   : > { %p1279_p3 = pneg %p1278_p2  ;;  %p1285_p10 = por %p1284_p7, %p1283_p6 }
  0x2e   : > { %p1286_p12 = pnand %p1285_p10, %p1279_p3 }
  0x30   : > { %1289 = shalt.err (!%p1286_p12)
}
  0x31   : > { %s1290_s18 = scalar_lea.vmem %s1630_s11, 1024  ;;  %s1487_s22 = smov [#allocation5]  }
  0x32   : > { %p1291_p0 = scmp.ne.s32.totalorder %s1630_s11, %s1290_s18  ;;  %s1295_s23 = sshll.u32 %s1487_s22, 4  ;;  %s1296_s23 = int_to_ptr.vmem [resolvable:$false] %s1295_s23 }
  0x33   : > { %s1297_s16 = scalar_lea.vmem %s1296_s23, 2048  ;;  %p1298_p9 = scmp.lt.s32.totalorder %s1630_s11, %s1296_s23 }
  0x34   : > { %p1293_p2 = pnand %p1291_p0, %p1638_p1  ;;  %p1299_p8 = scmp.lt.s32.totalorder %s1297_s16, %s1290_s18 }
  0x36   : > { %p1294_p11 = pneg %p1293_p2  ;;  %p1300_p4 = por %p1299_p8, %p1298_p9 }
  0x38   : > { %p1301_p5 = pnand %p1300_p4, %p1294_p11 }
  0x3a   : > { %1304 = shalt.err (!%p1301_p5)
}
  0x3b   : > { %s1949_s26 = smov 64   ;;  %s1951_s9 = smov 4  }
  0x3c   : > { %1182 = dma.hbm_to_vmem [thread:$0]  (!%p1616_p13), %s1627_s8, 1024, %s1630_s11, %s1632_s12, %s1949_s26, %s1949_s26, %s1951_s9  }
  0x3d   : > { %p1036_p8 = scmp.ge.s32.totalorder %s1485_s29, 1  ;;  %p373_p9 = scmp.lt.s32.totalorder %s1485_s29, 4 }
  0x3e   : > { %s1024_s18 = sshll.u32 %s1608_s17, 4  ;;  %s1074_s22 = sshll.u32 %s1481_s28, 8 }
  0x3f   : > { %p1667_p11 = pnand %p1036_p8, %p373_p9  ;;  %s1969_s0 = sld [smem:[#allocation20_spill]] }
  0x40   : > { %s275_s24 = scalar_lea.vmem [#allocation2], %s1024_s18  ;;  %s272_s8 = scalar_lea.sflag [#allocation3], %s1608_s17 }
  0x41   : > { %s1968_s10 = scalar_select %p1667_p11, 1, 0 }
  0x42   : > { %s284_s7 = sshll.u32 %s275_s24, 4  ;;  %s1678_s7 = int_to_ptr.vmem [resolvable:$true] %s284_s7 }
  0x45   : > { %s1676_s1 = scalar_lea.hbm %s1969_s0, %s1074_s22  ;;  %s1310_s23 = scalar_lea.hbm %s1969_s0, 768 }
  0x46   : > { %s1305_s11 = scalar_lea.hbm %s1676_s1, 256  ;;  %p1311_p10 = scmp.lt.u32.totalorder %s1676_s1, %s1969_s0 }
  0x47   : > { %p1306_p3 = scmp.ne.s32.totalorder %s1676_s1, %s1305_s11  ;;  %p1312_p12 = scmp.lt.u32.totalorder %s1310_s23, %s1305_s11 }
  0x48   : > { %p1314_p2 = scmp.lt.u32.totalorder %s1305_s11, %s1676_s1 }
  0x49   : > { %p1308_p6 = pnand %p1306_p3, %p1638_p1  ;;  %p1313_p0 = por %p1312_p12, %p1311_p10 }
  0x4b   : > { %p1309_p7 = pneg %p1308_p6  ;;  %p1315_p4 = por %p1314_p2, %p1313_p0 }
  0x4d   : > { %p1316_p5 = pnand %p1315_p4, %p1309_p7 }
  0x4f   : > { %1319 = shalt.err (!%p1316_p5)
}
  0x50   : > { %s1320_s24 = scalar_lea.vmem %s1678_s7, 256  ;;  %s1490_s26 = smov [#allocation2]  }
  0x51   : > { %p1321_p8 = scmp.ne.s32.totalorder %s1678_s7, %s1320_s24  ;;  %s1325_s9 = sshll.u32 %s1490_s26, 4  ;;  %s1326_s9 = int_to_ptr.vmem [resolvable:$false] %s1325_s9 }
  0x52   : > { %s1327_s18 = scalar_lea.vmem %s1326_s9, 512  ;;  %p1328_p6 = scmp.lt.s32.totalorder %s1678_s7, %s1326_s9 }
  0x53   : > { %p1323_p9 = pnand %p1321_p8, %p1638_p1  ;;  %p1329_p11 = scmp.lt.s32.totalorder %s1327_s18, %s1320_s24 }
  0x55   : > { %p1324_p3 = pneg %p1323_p9  ;;  %p1330_p10 = por %p1329_p11, %p1328_p6 }
  0x57   : > { %p1331_p12 = pnand %p1330_p10, %p1324_p3 }
  0x59   : > { %1334 = shalt.err (!%p1331_p12)
}
  0x5a   : > { %s1491_s11 = smov 128   ;;  %s1492_s23 = smov 8  }
  0x5b   : > { %1179 = dma.hbm_to_vmem [thread:$0]  (!%p1616_p13), %s1676_s1, 256, %s1678_s7, %s272_s8, %s1491_s11, %s1491_s11, %s1492_s23  }
  0x5c   : > { %s1708_s26 = scalar_lea.hbm %s1937_s3, %s1621_s21  ;;  %s325_s24 = scalar_lea.vmem [#allocation7], %s1612_s19 }
  0x5d   : > { %s332_s9 = sshll.u32 %s325_s24, 4  ;;  %s1335_s18 = scalar_lea.hbm %s1708_s26, 1024  ;;  %s1711_s9 = int_to_ptr.vmem [resolvable:$true] %s332_s9 }
  0x5e   : > { %p1336_p11 = scmp.ne.s32.totalorder %s1708_s26, %s1335_s18  ;;  %s1340_s7 = scalar_lea.hbm %s1937_s3, 3072 }
  0x5f   : > { %p1341_p2 = scmp.lt.u32.totalorder %s1708_s26, %s1937_s3  ;;  %p1342_p4 = scmp.lt.u32.totalorder %s1340_s7, %s1335_s18 }
  0x60   : > { %p1338_p7 = pnand %p1336_p11, %p1638_p1  ;;  %p1344_p8 = scmp.lt.u32.totalorder %s1335_s18, %s1708_s26 }
  0x61   : > { %p1343_p5 = por %p1342_p4, %p1341_p2 }
  0x62   : > { %p1339_p0 = pneg %p1338_p7 }
  0x63   : > { %p1345_p9 = por %p1344_p8, %p1343_p5 }
  0x65   : > { %p1346_p3 = pnand %p1345_p9, %p1339_p0 }
  0x67   : > { %1349 = shalt.err (!%p1346_p3)
}
  0x68   : > { %s1350_s23 = scalar_lea.vmem %s1711_s9, 1024  ;;  %s1493_s0 = smov [#allocation7]  }
  0x69   : > { %p1351_p6 = scmp.ne.s32.totalorder %s1711_s9, %s1350_s23  ;;  %s1355_s22 = sshll.u32 %s1493_s0, 4  ;;  %s1356_s22 = int_to_ptr.vmem [resolvable:$false] %s1355_s22 }
  0x6a   : > { %s1357_s16 = scalar_lea.vmem %s1356_s22, 2048  ;;  %p1358_p11 = scmp.lt.s32.totalorder %s1711_s9, %s1356_s22 }
  0x6b   : > { %p1353_p10 = pnand %p1351_p6, %p1638_p1  ;;  %p1359_p7 = scmp.lt.s32.totalorder %s1357_s16, %s1350_s23 }
  0x6d   : > { %p1354_p12 = pneg %p1353_p10  ;;  %p1360_p2 = por %p1359_p7, %p1358_p11 }
  0x6f   : > { %p1361_p4 = pnand %p1360_p2, %p1354_p12 }
  0x71   : > { %1364 = shalt.err (!%p1361_p4)
}
  0x72   : > { %s1970_s24 = smov 4   ;;  %s1971_s18 = smov 64  }
  0x73   : > { %1185 = dma.hbm_to_vmem [thread:$0]  (!%p1616_p13), %s1708_s26, 1024, %s1711_s9, %s1632_s12, %s1971_s18, %s1971_s18, %s1970_s24  }
  0x74   : > { %s1742_s8 = scalar_lea.hbm %s1939_s5, %s1621_s21  ;;  %s352_s11 = scalar_lea.vmem [#allocation8], %s1612_s19 }
  0x75   : > { %s359_s23 = sshll.u32 %s352_s11, 4  ;;  %s349_s0 = scalar_lea.sflag [#allocation9], %s1608_s17  ;;  %s1745_s23 = int_to_ptr.vmem [resolvable:$true] %s359_s23 }
  0x76   : > { %s1365_s22 = scalar_lea.hbm %s1742_s8, 1024  ;;  %s1370_s9 = scalar_lea.hbm %s1939_s5, 3072 }
  0x77   : > { %p1366_p0 = scmp.ne.s32.totalorder %s1742_s8, %s1365_s22  ;;  %p1371_p9 = scmp.lt.u32.totalorder %s1742_s8, %s1939_s5 }
  0x78   : > { %p1372_p3 = scmp.lt.u32.totalorder %s1370_s9, %s1365_s22  ;;  %p1374_p10 = scmp.lt.u32.totalorder %s1365_s22, %s1742_s8 }
  0x79   : > { %p1368_p5 = pnand %p1366_p0, %p1638_p1 }
  0x7a   : > { %p1373_p6 = por %p1372_p3, %p1371_p9 }
  0x7b   : > { %p1369_p8 = pneg %p1368_p5 }
  0x7c   : > { %p1375_p12 = por %p1374_p10, %p1373_p6 }
  0x7e   : > { %p1376_p11 = pnand %p1375_p12, %p1369_p8 }
  0x80   : > { %1379 = shalt.err (!%p1376_p11)
}
  0x81   : > { %s1380_s19 = scalar_lea.vmem %s1745_s23, 1024  ;;  %s1494_s1 = smov [#allocation8]  }
  0x82   : > { %p1381_p7 = scmp.ne.s32.totalorder %s1745_s23, %s1380_s19  ;;  %s1385_s7 = sshll.u32 %s1494_s1, 4  ;;  %s1386_s7 = int_to_ptr.vmem [resolvable:$false] %s1385_s7 }
  0x83   : > { %s1387_s11 = scalar_lea.vmem %s1386_s7, 2048  ;;  %p1388_p0 = scmp.lt.s32.totalorder %s1745_s23, %s1386_s7 }
  0x84   : > { %p1383_p2 = pnand %p1381_p7, %p1638_p1  ;;  %p1389_p5 = scmp.lt.s32.totalorder %s1387_s11, %s1380_s19 }
  0x86   : > { %p1384_p4 = pneg %p1383_p2  ;;  %p1390_p9 = por %p1389_p5, %p1388_p0 }
  0x88   : > { %p1391_p3 = pnand %p1390_p9, %p1384_p4 }
  0x8a   : > { %1394 = shalt.err (!%p1391_p3)
}
  0x8b   : > { %1188 = dma.hbm_to_vmem [thread:$0]  (!%p1616_p13), %s1742_s8, 1024, %s1745_s23, %s349_s0, %s1971_s18, %s1971_s18, %s1970_s24  }
  0x8c   : > { %p1972_p1 = scmp.ne.s32.totalorder %s1968_s10, 0 }
  0x8d   : > { %s1777_s15 = sand.u32 (!%p1972_p1), 1, %s1469_s25   ;;  %p1973_p8 = scmp.ne.s32.totalorder (!%p1972_p1), %s1960_s13, 0 }
  0x8e   : > { %377 = sbr.rel (%p1972_p1) target bundleno = 861 (0x35d), region = 48  ;;  %s1037_s22 = sshll.u32 (!%p1972_p1), %s1777_s15, 4 }
  0x8f   : > { %s380_s20 = scalar_lea.sflag (!%p1972_p1), [#allocation3], %s1777_s15  ;;  %s1783_s12 = scalar_lea.vmem (!%p1972_p1), [#allocation2], %s1037_s22 }
  0x95   : > { %1448 = dma.done.wait (%p1973_p8), %s380_s20, 256  }
  0x96   : > { %1450 = vsyncadd (%p1973_p8), %s380_s20, 4294967040  ;;  %s388_s17 = sand.u32 1, %s1571_s30   ;;  %s1038_s10 = sshll.u32 %s1777_s15, 6 }
  0x97   : > { %s389_s24 = scalar_lea.sflag [#allocation6], %s388_s17  ;;  %s1791_s18 = scalar_lea.vmem [#allocation5], %s1038_s10 }
  0x98   : > { %1452 = dma.done.wait (%p1973_p8), %s389_s24, 2048  }
  0x99   : > { %1454 = vsyncadd (%p1973_p8), %s389_s24, 4294965248  ;;  %s1797_s8 = scalar_lea.vmem [#allocation7], %s1038_s10  ;;  %s407_s23 = scalar_lea.sflag [#allocation9], %s1777_s15 }
  0x9a   : > { %s1800_s0 = scalar_lea.vmem [#allocation8], %s1038_s10 }
  0x9b   : > { %1456 = dma.done.wait (%p1973_p8), %s407_s23, 1024  }
  0x9c   : > { %1458 = vsyncadd (%p1973_p8), %s407_s23, 4294966272  ;;  %v1495_v0 = vmov 0.0   ;;  %vm1496_vm0 = vmmov 0   ;;  %v1251_v1 = vld [vmem:[%s1791_s18] sm:$0xff]   ;;  %v1252_v2 = vld [vmem:[%s1791_s18 + $0x8] sm:$0xff]   ;;  %p466_p13 = scmp.lt.s32.totalorder %s1477_s27, 2 }
  0x9d   : > { %1106 = vmatprep.subr.bf16.mxu0 %v1495_v0  ;;  %1122 = vmatprep.mubr.msk.bf16.mxu0 %vm1496_vm0, %v1495_v0  ;;  %v1253_v3 = vld [vmem:[%s1791_s18 + $0x10] sm:$0xff]   ;;  %v1259_v4 = vld [vmem:[%s1797_s8] sm:$0xff]   ;;  %v1254_v5 = vld [vmem:[%s1791_s18 + $0x18] sm:$0xff]   ;;  %s464_s20 = scalar_lea.vmem [#allocation10], %s1037_s22  ;;  %s1078_s17 = sshll.u32 %s1477_s27, 8 }
  0x9e   : > { %1126 = vmatprep.subr.bf16.mxu1 %v1495_v0  ;;  %1142 = vmatprep.mubr.msk.bf16.mxu1 %vm1496_vm0, %v1495_v0  ;;  %v1260_v6 = vld [vmem:[%s1797_s8 + $0x8] sm:$0xff]   ;;  %v1255_v7 = vld [vmem:[%s1791_s18 + $0x20] sm:$0xff]   ;;  %v1261_v8 = vld [vmem:[%s1797_s8 + $0x10] sm:$0xff]   ;;  %s1861_s30 = scalar_select %p466_p13, %s1477_s27, 2 }
  0x9f   : > { %1107 = vmatpush3.bf16.msra.mxu0 %v1251_v1  ;;  %1127 = vmatpush3.bf16.msra.mxu1 %v1259_v4  ;;  %v1256_v9 = vld [vmem:[%s1791_s18 + $0x28] sm:$0xff]   ;;  %v1262_v10 = vld [vmem:[%s1797_s8 + $0x18] sm:$0xff]   ;;  %v1257_v11 = vld [vmem:[%s1791_s18 + $0x30] sm:$0xff]   ;;  %s825_s22 = scalar_lea.sflag [#allocation4], %s1777_s15  ;;  %p1975_p10 = scmp.ne.s32.totalorder %s1961_s14, 0 }
  0xa0   : > { %1108 = vmatprep.subr.bf16.mxu0 %v1495_v0  ;;  %1128 = vmatprep.subr.bf16.mxu1 %v1495_v0  ;;  %v1263_v12 = vld [vmem:[%s1797_s8 + $0x20] sm:$0xff]   ;;  %v1258_v13 = vld [vmem:[%s1791_s18 + $0x38] sm:$0xff]   ;;  %v1264_v16 = vld [vmem:[%s1797_s8 + $0x28] sm:$0xff]   ;;  %s468_s9 = scalar_lea.vmem %s1936_s2, %s1861_s30  ;;  %s471_s19 = scalar_lea.vmem %s1938_s4, %s1861_s30 }
  0xa1   : > { %v477_v14 = vld [vmem:[%s1783_s12] sm:$0xff]  ;;  %v478_v15 = vld [vmem:[%s1783_s12 + $0x8] sm:$0xff]  ;;  %s474_s11 = scalar_lea.vmem %s1940_s6, %s1861_s30  ;;  %s840_s12 = sshll.u32 %s464_s20, 4  ;;  %s1881_s12 = int_to_ptr.vmem [resolvable:$true] %s840_s12 }
  0xa2   : > { %v496_v17 = vpack.c.bf16 %v478_v15, %v477_v14  ;;  %v1265_v18 = vld [vmem:[%s1797_s8 + $0x30] sm:$0xff]   ;;  %v1266_v19 = vld [vmem:[%s1797_s8 + $0x38] sm:$0xff]   ;;  %v1267_v20 = vld [vmem:[%s1800_s0] sm:$0xff]   ;;  %s1974_s18 = sld [smem:[#allocation22_spill]]  ;;  %s1395_s27 = scalar_lea.vmem %s1881_s12, 256 }
  0xa3   : > { %1109 = vmatpush3.bf16.msra.mxu0 %v1252_v2  ;;  %1129 = vmatpush3.bf16.msra.mxu1 %v1260_v6  ;;  %v1268_v21 = vld [vmem:[%s1800_s0 + $0x8] sm:$0xff]   ;;  %v1269_v22 = vld [vmem:[%s1800_s0 + $0x10] sm:$0xff]   ;;  %v1270_v23 = vld [vmem:[%s1800_s0 + $0x18] sm:$0xff]   ;;  %p1396_p6 = scmp.ne.s32.totalorder %s1881_s12, %s1395_s27  ;;  %s1497_s23 = smov [#allocation10]  }
  0xa4   : > { %1110 = vmatprep.subr.bf16.mxu0 %v1495_v0  ;;  %1130 = vmatprep.subr.bf16.mxu1 %v1495_v0  ;;  %v1271_v24 = vld [vmem:[%s1800_s0 + $0x20] sm:$0xff]   ;;  %v1272_v25 = vld [vmem:[%s1800_s0 + $0x28] sm:$0xff]   ;;  %v1273_v36 = vld [vmem:[%s1800_s0 + $0x30] sm:$0xff]  }
  0xa5   : > { %v1042_v26 = vld [vmem:[%s468_s9] ss:$0 sm:$0xff]  ;;  %v1274_v37 = vld [vmem:[%s1800_s0 + $0x38] sm:$0xff]   ;;  %p1397_p12 = pnand %p1396_p6, %p1975_p10  ;;  %s1399_s0 = sshll.u32 %s1497_s23, 4  ;;  %s1400_s0 = int_to_ptr.vmem [resolvable:$false] %s1399_s0 }
  0xa6   : > { %v1051_v38 = vld [vmem:[%s471_s19] ss:$0 sm:$0xff]  ;;  %s1401_s30 = scalar_lea.vmem %s1400_s0, 512  ;;  %p1402_p7 = scmp.lt.s32.totalorder %s1881_s12, %s1400_s0 }
  0xa7   : > { %1111 = vmatpush3.bf16.msra.mxu0 %v1253_v3  ;;  %1131 = vmatpush3.bf16.msra.mxu1 %v1261_v8  ;;  %v1060_v48 = vld [vmem:[%s474_s11] ss:$0 sm:$0xff]  ;;  %p1398_p11 = pneg %p1397_p12  ;;  %p1403_p2 = scmp.lt.s32.totalorder %s1401_s30, %s1395_s27 }
  0xa8   : > { %1112 = vmatprep.subr.bf16.mxu0 %v1495_v0  ;;  %1132 = vmatprep.subr.bf16.mxu1 %v1495_v0  ;;  %s1886_s8 = scalar_lea.hbm %s1974_s18, %s1078_s17 }
  0xa9   : > { %p1404_p4 = por %p1403_p2, %p1402_p7 }
  0xab   : > { %1113 = vmatpush3.bf16.msra.mxu0 %v1254_v5  ;;  %1133 = vmatpush3.bf16.msra.mxu1 %v1262_v10  ;;  %p1405_p0 = pnand %p1404_p4, %p1398_p11 }
  0xac   : > { %1114 = vmatprep.subr.bf16.mxu0 %v1495_v0  ;;  %1134 = vmatprep.subr.bf16.mxu1 %v1495_v0 }
  0xaf   : > { %1115 = vmatpush3.bf16.msra.mxu0 %v1255_v7  ;;  %1135 = vmatpush3.bf16.msra.mxu1 %v1263_v12 }
  0xb0   : > { %1116 = vmatprep.subr.bf16.mxu0 %v1495_v0  ;;  %1136 = vmatprep.subr.bf16.mxu1 %v1495_v0 }
  0xb3   : > { %1117 = vmatpush3.bf16.msra.mxu0 %v1256_v9  ;;  %1137 = vmatpush3.bf16.msra.mxu1 %v1264_v16 }
  0xb4   : > { %1118 = vmatprep.subr.bf16.mxu0 %v1495_v0  ;;  %1138 = vmatprep.subr.bf16.mxu1 %v1495_v0 }
  0xb7   : > { %1119 = vmatpush3.bf16.msra.mxu0 %v1257_v11  ;;  %1139 = vmatpush3.bf16.msra.mxu1 %v1265_v18 }
  0xb8   : > { %1120 = vmatprep.subr.bf16.mxu0 %v1495_v0  ;;  %1140 = vmatprep.subr.bf16.mxu1 %v1495_v0 }
  0xbb   : > { %1121 = vmatpush3.bf16.msra.mxu0 %v1258_v13  ;;  %1141 = vmatpush3.bf16.msra.mxu1 %v1266_v19 }
  0xbc   : > { %1146 = vmatprep.subr.bf16.mxu0 %v1495_v0 }
  0xbe   : > { %1123 = vmatmul.mubr.bf16.vlgmr.msra.gmra.mrb[0].mxu0 %v496_v17 }
  0xbf   : > { %1162 = vmatprep.mubr.msk.bf16.mxu0 %vm1496_vm0, %v1495_v0  ;;  %1147 = vmatpush3.bf16.msra.mxu0 %v1267_v20 }
  0xc0   : > { %1148 = vmatprep.subr.bf16.mxu0 %v1495_v0 }
  0xc3   : > { %1149 = vmatpush3.bf16.msra.mxu0 %v1268_v21 }
  0xc4   : > { %1150 = vmatprep.subr.bf16.mxu0 %v1495_v0 }
  0xc7   : > { %1151 = vmatpush3.bf16.msra.mxu0 %v1269_v22 }
  0xc8   : > { %1152 = vmatprep.subr.bf16.mxu0 %v1495_v0 }
  0xcb   : > { %1153 = vmatpush3.bf16.msra.mxu0 %v1270_v23 }
  0xcc   : > { %1154 = vmatprep.subr.bf16.mxu0 %v1495_v0 }
  0xcf   : > { %1155 = vmatpush3.bf16.msra.mxu0 %v1271_v24 }
  0xd0   : > { %1156 = vmatprep.subr.bf16.mxu0 %v1495_v0 }
  0xd3   : > { %1157 = vmatpush3.bf16.msra.mxu0 %v1272_v25 }
  0xd4   : > { %1158 = vmatprep.subr.bf16.mxu0 %v1495_v0 }
  0xd7   : > { %1159 = vmatpush3.bf16.msra.mxu0 %v1273_v36 }
  0xd8   : > { %1160 = vmatprep.subr.bf16.mxu0 %v1495_v0 }
  0xdb   : > { %1161 = vmatpush3.bf16.msra.mxu0 %v1274_v37 }
 0x191   : > { %v585_v27 = vpop.f32.mrb[0].mxu0 }
 0x192   : > { %v586_v28 = vadd.f32 %v1042_v26, %v585_v27  ;;  %v1124_v29 = vpop.f32.mrb[1].mxu0 }
 0x193   : > { %v588_v30 = vpop.f32.mrb[2].mxu0 }
 0x194   : > { %v589_v31 = vadd.f32 %v1042_v26, %v588_v30  ;;  %v1125_v32 = vpop.f32.mrb[3].mxu0  ;;  %v592_v33 = vmax.f32 %v586_v28, 0.0 }
 0x196   : > { %v593_v34 = vmax.f32 %v589_v31, 0.0 }
 0x198   : > { %v611_v35 = vpack.c.bf16 %v593_v34, %v592_v33 }
 0x19a   : > { %1143 = vmatmul.mubr.bf16.vlgmr.msra.gmra.mrb[0].mxu1 %v611_v35 }
 0x26d   : > { %v700_v39 = vpop.f32.mrb[0].mxu1 }
 0x26e   : > { %v701_v40 = vadd.f32 %v1051_v38, %v700_v39  ;;  %v1144_v41 = vpop.f32.mrb[1].mxu1 }
 0x26f   : > { %v703_v42 = vpop.f32.mrb[2].mxu1 }
 0x270   : > { %v704_v43 = vadd.f32 %v1051_v38, %v703_v42  ;;  %v1145_v44 = vpop.f32.mrb[3].mxu1  ;;  %v707_v45 = vmax.f32 %v701_v40, 0.0 }
 0x272   : > { %v708_v46 = vmax.f32 %v704_v43, 0.0 }
 0x274   : > { %v726_v47 = vpack.c.bf16 %v708_v46, %v707_v45 }
 0x276   : > { %1163 = vmatmul.mubr.bf16.vlgmr.msra.gmra.mrb[4].mxu0 %v726_v47 }
 0x349   : > { %v815_v49 = vpop.f32.mrb[4].mxu0 }
 0x34a   : > { %v816_v50 = vadd.f32 %v1060_v48, %v815_v49  ;;  %v1164_v51 = vpop.f32.mrb[5].mxu0 }
 0x34b   : > { %v818_v52 = vpop.f32.mrb[6].mxu0 }
 0x34c   : > { %822 = vst [vmem:[%s464_s20] sm:$0xff] %v816_v50  ;;  %v819_v53 = vadd.f32 %v1060_v48, %v818_v52  ;;  %v1165_v54 = vpop.f32.mrb[7].mxu0 }
 0x34e   : > { %823 = vst [vmem:[%s464_s20 + $0x8] sm:$0xff] %v819_v53 }
 0x34f   : > { %1408 = shalt.err (!%p1405_p0)
}
 0x350   : > { %s1409_s13 = scalar_lea.hbm %s1886_s8, 256  ;;  %s1413_s21 = scalar_lea.hbm %s1974_s18, 768 }
 0x351   : > { %p1410_p5 = scmp.ne.s32.totalorder %s1886_s8, %s1409_s13  ;;  %p1414_p1 = scmp.lt.u32.totalorder %s1886_s8, %s1974_s18 }
 0x352   : > { %p1415_p8 = scmp.lt.u32.totalorder %s1413_s21, %s1409_s13  ;;  %p1417_p6 = scmp.lt.u32.totalorder %s1409_s13, %s1886_s8 }
 0x353   : > { %p1411_p9 = pnand %p1410_p5, %p1975_p10 }
 0x354   : > { %p1416_p13 = por %p1415_p8, %p1414_p1 }
 0x355   : > { %p1412_p3 = pneg %p1411_p9 }
 0x356   : > { %p1418_p12 = por %p1417_p6, %p1416_p13 }
 0x358   : > { %p1419_p11 = pnand %p1418_p12, %p1412_p3 }
 0x35a   : > { %1422 = shalt.err (!%p1419_p11)
}
 0x35b   : > { %s1498_s1 = smov 128   ;;  %s1499_s7 = smov 8  }
 0x35c   : > { %1174 = dma.vmem_to_hbm [thread:$0]  (%p1975_p10), %s1881_s12, 256, %s1886_s8, %s825_s22, %s1498_s1, %s1498_s1, %s1499_s7  }
 0x35d PF: > { %s1976_s11 = sld [smem:[#allocation15_spill]]  ;;  %s1977_s20 = sld [smem:[#allocation19_spill]] }
 0x35e   : > { %p1194_p7 = scmp.ge.s32.totalorder %s1485_s29, 2 }
 0x363   : > { %s855_s17 = sand.u32 1, %s1976_s11   ;;  %p1978_p2 = scmp.ne.s32.totalorder %s1977_s20, 0 }
 0x364   : > { %s856_s10 = scalar_lea.sflag [#allocation4], %s855_s17 }
 0x365   : > { %p1190_p4 = pnand %p1194_p7, %p1978_p2 }
 0x367   : > { %1460 = dma.done.wait (!%p1190_p4), %s856_s10, 256  }
 0x368   : > { %1462 = vsyncadd (!%p1190_p4), %s856_s10, 4294967040  ;;  %s29_s29 = sadd.s32 1, %s1485_s29   ;;  %s1979_s27 = sld [smem:[#allocation16_spill]] }
 0x369   : > { %p26_p0 = scmp.ge.s32.totalorder %s29_s29, 5   ;;  %s1980_s26 = sld [smem:[#allocation18_spill]] }
 0x36a   : > { %s1981_s14 = sld [smem:[#allocation17_spill]]  ;;  %s1982_s24 = smov %s1469_s25 }
 0x36b   :  { %28 = sbr.rel (!%p26_p0) target bundleno = 14 (0xe), region = 139 }
 0x36e   : > { %s1983_s25 = smov %s1979_s27  ;;  %s1984_s27 = smov %s1481_s28 }
 0x370   : > { %s1985_s28 = smov %s1981_s14 }
 0x372   :  { %861 = vsyncpa [#allocation3], 1 }
 0x373   :  { %863 = vsyncpa [#allocation3 + $0x1], 1 }
 0x374   :  { %864 = vsyncpa [#allocation6], 1 }
 0x375   :  { %866 = vsyncpa [#allocation6 + $0x1], 1 }
 0x376   :  { %867 = vsyncpa [#allocation9], 1 }
 0x377   :  { %869 = vsyncpa [#allocation9 + $0x1], 1 }
 0x378   :  { %870 = vsyncpa [#allocation4], 1 }
 0x379   :  { %872 = vsyncpa [#allocation4 + $0x1], 1 }

</bundles_post_ra>
